<compile_context>
chip_gen: v7x
topology: tpu7x:2x2x1
jax: 0.10.0
libtpu: 0.0.40
codegen_flags: <defaults>
</compile_context>

<pallas_src>
import functools

import jax
import jax.numpy as jnp
from jax.experimental import pallas as pl
from jax.experimental.pallas import tpu as pltpu


# ----------------------------------------------------------------------------
# Config (small synthetic MT5 encoder)
# ----------------------------------------------------------------------------
VOCAB = 256
D_MODEL = 32
NUM_HEADS = 4
D_KV = 8
D_FF = 64
NUM_LAYERS = 2
REL_BUCKETS = 32
REL_MAX_DIST = 128
NUM_LABELS = 2
EPS = 1e-6


# ----------------------------------------------------------------------------
# Fused Pallas kernel: encoder stack + final RMSNorm + pooled classifier head
# (one grid program per batch element)
# ----------------------------------------------------------------------------
def fused_mt5_kernel(num_layers, num_heads, d_kv, seq,
                     x_ref, bm_ref,
                     ln1_ref, wqkv_ref, wo_attn_ref,
                     ln2_ref, wi01_ref, wo_ff_ref,
                     lnf_ref, clsw_ref, clsb_ref,
                     out_ref):
    """Forward for ONE batch element.

    x_ref:      (1, S, D)        token embeddings (f32)
    bm_ref:     (1, H, S, S)     rel-pos bias + additive key mask (f32)
    wqkv_ref:   (L, D, 3*H*dkv)  fused lane-dense Q|K|V projection (bf16)
    wo_attn_ref:(L, H*dkv, D)    fused attention output projection (bf16)
    wi01_ref:   (L, D, 2*dff)    fused gated-FFN wi_0|wi_1 (bf16)
    wo_ff_ref:  (L, dff, D)      FFN output projection (bf16)
    """
    H, S = num_heads, seq
    HK = H * d_kv
    dff = wo_ff_ref.shape[1]
    bf16 = jnp.bfloat16

    x = x_ref[0]                                        # (S, D) f32

    for l in range(num_layers):                         # static unroll (small L)
        # ---------------- self-attention block ----------------
        var = jnp.mean(x * x, axis=-1, keepdims=True)
        xn = x * jax.lax.rsqrt(var + EPS) * ln1_ref[l]  # T5 RMSNorm (no mean sub)

        # fused Q|K|V projection: one (S, D) @ (D, 3*H*dkv) matmul
        qkv = jnp.dot(xn.astype(bf16), wqkv_ref[l],
                      preferred_element_type=jnp.float32)          # (S, 3*HK)

        # per-head scores / softmax / context (tiny 2-D dots; batched dot_general
        # would serialize on the MXU the same way)
        ctx_cols = []
        for h in range(H):
            qh = qkv[:, h * d_kv:(h + 1) * d_kv].astype(bf16)          # (S, dkv)
            kh = qkv[:, HK + h * d_kv:HK + (h + 1) * d_kv].astype(bf16)
            vh = qkv[:, 2 * HK + h * d_kv:2 * HK + (h + 1) * d_kv].astype(bf16)

            # T5/MT5 attention has no 1/sqrt(d_k) scaling.
            s = jnp.einsum('qd,kd->qk', qh, kh,
                           preferred_element_type=jnp.float32) + bm_ref[0, h]
            s = s - jnp.max(s, axis=-1, keepdims=True)
            p = jnp.exp(s)                                             # f32
            denom = jnp.sum(p, axis=-1, keepdims=True)
            # max-subtraction guarantees denom >= 1; eps is belt-and-braces
            p = p * pl.reciprocal(denom + 1e-9, approx=True)
            ctx_cols.append(jnp.dot(p.astype(bf16), vh,
                                    preferred_element_type=jnp.float32))  # (S, dkv)

        ctx = jnp.concatenate(ctx_cols, axis=-1)                       # (S, H*dkv)
        # fused output projection: one (S, H*dkv) @ (H*dkv, D) matmul
        attn = jnp.dot(ctx.astype(bf16), wo_attn_ref[l],
                       preferred_element_type=jnp.float32)             # (S, D)
        x = x + attn

        # ---------------- gated-GELU feed-forward block ----------------
        var2 = jnp.mean(x * x, axis=-1, keepdims=True)
        xn2 = x * jax.lax.rsqrt(var2 + EPS) * ln2_ref[l]
        gl = jnp.dot(xn2.astype(bf16), wi01_ref[l],
                     preferred_element_type=jnp.float32)               # (S, 2*dff)
        gate = jax.nn.gelu(gl[:, :dff], approximate=True)              # gelu_new
        lin = gl[:, dff:]
        x = x + jnp.dot((gate * lin).astype(bf16), wo_ff_ref[l],
                        preferred_element_type=jnp.float32)

    # ---- pool token 0, final RMSNorm, classifier head ----
    # (final RMSNorm is position-wise, so normalizing only the pooled row is
    #  identical to normalizing the full hidden state and then pooling)
    pooled = x[0:1, :]                                                 # (1, D)
    varf = jnp.mean(pooled * pooled, axis=-1, keepdims=True)
    pn = pooled * jax.lax.rsqrt(varf + EPS) * lnf_ref[...]
    # dropout(p=0.1) is identity in eval mode
    logits = jnp.dot(pn.astype(bf16), clsw_ref[...],
                     preferred_element_type=jnp.float32) + clsb_ref[...]  # (1, NL)
    out_ref[...] = logits.reshape(1, 1, NUM_LABELS)


def run_fused_forward(params, x, biasmask):
    B, S, D = x.shape
    L, H, dkv, dff = NUM_LAYERS, NUM_HEADS, D_KV, D_FF
    kern = functools.partial(fused_mt5_kernel, L, H, dkv, S)

    out = pl.pallas_call(
        kern,
        out_shape=jax.ShapeDtypeStruct((B, 1, NUM_LABELS), jnp.float32),
        grid=(B,),
        in_specs=[
            pl.BlockSpec((1, S, D), lambda b: (b, 0, 0)),               # x
            pl.BlockSpec((1, H, S, S), lambda b: (b, 0, 0, 0)),         # bias+mask
            pl.BlockSpec((L, 1, D), lambda b: (0, 0, 0)),               # ln1
            pl.BlockSpec((L, D, 3 * H * dkv), lambda b: (0, 0, 0)),     # Wqkv
            pl.BlockSpec((L, H * dkv, D), lambda b: (0, 0, 0)),         # Wo (attn)
            pl.BlockSpec((L, 1, D), lambda b: (0, 0, 0)),               # ln2
            pl.BlockSpec((L, D, 2 * dff), lambda b: (0, 0, 0)),         # wi_0|wi_1
            pl.BlockSpec((L, dff, D), lambda b: (0, 0, 0)),             # wo (ffn)
            pl.BlockSpec((1, D), lambda b: (0, 0)),                     # final LN
            pl.BlockSpec((D, NUM_LABELS), lambda b: (0, 0)),            # cls W
            pl.BlockSpec((1, NUM_LABELS), lambda b: (0, 0)),            # cls b
        ],
        out_specs=pl.BlockSpec((1, 1, NUM_LABELS), lambda b: (b, 0, 0)),
        compiler_params=pltpu.CompilerParams(
            dimension_semantics=("parallel",)),
    )(x, biasmask,
      params["ln1"], params["wqkv"], params["wo_attn"],
      params["ln2"], params["wi01"], params["wo_ff"],
      params["final_ln"], params["cls_w"], params["cls_b"])
    return out.reshape(B, NUM_LABELS)


# ----------------------------------------------------------------------------
# Glue: params, relative position bias + mask, embedding lookup, full forward
# ----------------------------------------------------------------------------
def init_params(key):
    def nrm(k, shape, dtype=jnp.float32, scale=0.02):
        return (scale * jax.random.normal(k, shape)).astype(dtype)

    keys = jax.random.split(key, 7)
    bf = jnp.bfloat16
    return {
        "embed": nrm(keys[0], (VOCAB, D_MODEL)),
        "rel_emb": nrm(keys[1], (REL_BUCKETS, NUM_HEADS)),
        "final_ln": jnp.ones((1, D_MODEL), jnp.float32),
        "cls_w": nrm(keys[2], (D_MODEL, NUM_LABELS), bf),
        "cls_b": jnp.zeros((1, NUM_LABELS), jnp.float32),
        "ln1": jnp.ones((NUM_LAYERS, 1, D_MODEL), jnp.float32),
        # fused lane-dense Q|K|V projection: (L, D, 3*H*d_kv), bf16
        "wqkv": nrm(keys[3], (NUM_LAYERS, D_MODEL, 3 * NUM_HEADS * D_KV), bf),
        # fused lane-dense attention output projection: (L, H*d_kv, D), bf16
        "wo_attn": nrm(keys[4], (NUM_LAYERS, NUM_HEADS * D_KV, D_MODEL), bf),
        "ln2": jnp.ones((NUM_LAYERS, 1, D_MODEL), jnp.float32),
        # fused gated-FFN input projections wi_0|wi_1: (L, D, 2*d_ff), bf16
        "wi01": nrm(keys[5], (NUM_LAYERS, D_MODEL, 2 * D_FF), bf),
        "wo_ff": nrm(keys[6], (NUM_LAYERS, D_FF, D_MODEL), bf),
    }


def _relative_position_bucket(rel_pos, num_buckets=REL_BUCKETS, max_distance=REL_MAX_DIST):
    # Bidirectional T5 bucketing.
    num_buckets //= 2
    ret = (rel_pos > 0).astype(jnp.int32) * num_buckets
    n = jnp.abs(rel_pos)
    max_exact = num_buckets // 2
    is_small = n < max_exact
    val_if_large = max_exact + (
        jnp.log(jnp.maximum(n, 1).astype(jnp.float32) / max_exact)
        / jnp.log(max_distance / max_exact) * (num_buckets - max_exact)
    ).astype(jnp.int32)
    val_if_large = jnp.minimum(val_if_large, num_buckets - 1)
    return ret + jnp.where(is_small, n, val_if_large)


def compute_position_bias(rel_emb, seq_len):
    ctx = jnp.arange(seq_len)[:, None]
    mem = jnp.arange(seq_len)[None, :]
    buckets = _relative_position_bucket(mem - ctx)             # (S, S)
    bias = rel_emb[buckets]                                    # (S, S, H)
    return jnp.transpose(bias, (2, 0, 1)).astype(jnp.float32)  # (H, S, S)


def build_bias_mask(rel_emb, attention_mask):
    """(B, H, S, S) = shared rel-pos bias + per-example additive key mask."""
    B, S = attention_mask.shape
    pos_bias = compute_position_bias(rel_emb, S)                       # (H, S, S)
    key_mask = (1.0 - attention_mask.astype(jnp.float32)) * -1e9       # (B, S)
    return pos_bias[None, :, :, :] + key_mask[:, None, None, :]        # (B, H, S, S)


def mt5_classifier_forward(params, input_ids, attention_mask, labels=None):
    B, S = input_ids.shape
    # embedding lookup (glue); embedding dropout = identity (eval)
    x = params["embed"][input_ids].astype(jnp.float32)                 # (B, S, D)
    biasmask = build_bias_mask(params["rel_emb"], attention_mask)      # (B, H, S, S)

    logits = run_fused_forward(params, x, biasmask)                    # (B, NUM_LABELS)

    loss = None
    if labels is not None:
        logp = jax.nn.log_softmax(logits, axis=-1)
        loss = -jnp.mean(jnp.take_along_axis(logp, labels[:, None], axis=-1))
    return {"loss": loss, "logits": logits}


# ----------------------------------------------------------------------------
if __name__ == "__main__":
    key = jax.random.PRNGKey(0)
    pkey, ikey, lkey = jax.random.split(key, 3)

    params = init_params(pkey)

    B, S = 2, 8
    input_ids = jax.random.randint(ikey, (B, S), 0, VOCAB, dtype=jnp.int32)
    attention_mask = jnp.ones((B, S), dtype=jnp.int32)
    labels = jax.random.randint(lkey, (B,), 0, NUM_LABELS, dtype=jnp.int32)

    fwd = jax.jit(mt5_classifier_forward)
    out = fwd(params, input_ids, attention_mask, labels)
    logits = jax.block_until_ready(out["logits"])
    loss = jax.block_until_ready(out["loss"])
    assert logits.shape == (B, NUM_LABELS)
    assert bool(jnp.all(jnp.isfinite(logits)))
    assert bool(jnp.isfinite(loss))
    print("KERNEL_OK")
</pallas_src>

<mosaic_0001>
module attributes {stable_mosaic.version = 11 : i64} {
  func.func @fused_mt5_kernel(%arg0: i32, %arg1: memref<1x8x32xf32, #tpu.memory_space<vmem>>, %arg2: memref<1x4x8x8xf32, #tpu.memory_space<vmem>>, %arg3: memref<2x1x32xf32, #tpu.memory_space<vmem>>, %arg4: memref<2x32x96xbf16, #tpu.memory_space<vmem>>, %arg5: memref<2x32x32xbf16, #tpu.memory_space<vmem>>, %arg6: memref<2x1x32xf32, #tpu.memory_space<vmem>>, %arg7: memref<2x32x128xbf16, #tpu.memory_space<vmem>>, %arg8: memref<2x64x32xbf16, #tpu.memory_space<vmem>>, %arg9: memref<1x32xf32, #tpu.memory_space<vmem>>, %arg10: memref<32x2xbf16, #tpu.memory_space<vmem>>, %arg11: memref<1x2xf32, #tpu.memory_space<vmem>>, %arg12: memref<1x1x2xf32, #tpu.memory_space<vmem>>) attributes {dimension_semantics = [#tpu.dimension_semantics<parallel>], iteration_bounds = array<i64: 2>, scalar_prefetch = 0 : i64, scratch_operands = 0 : i64, tpu.core_type = #tpu.core_type<tc>, window_params = [{transform_indices = @transform_0, window_bounds = array<i64: 1, 8, 32>}, {transform_indices = @transform_1, window_bounds = array<i64: 1, 4, 8, 8>}, {pipeline_mode = #tpu.pipeline_mode<synchronous>, transform_indices = @transform_2, window_bounds = array<i64: 2, 1, 32>}, {pipeline_mode = #tpu.pipeline_mode<synchronous>, transform_indices = @transform_3, window_bounds = array<i64: 2, 32, 96>}, {pipeline_mode = #tpu.pipeline_mode<synchronous>, transform_indices = @transform_4, window_bounds = array<i64: 2, 32, 32>}, {pipeline_mode = #tpu.pipeline_mode<synchronous>, transform_indices = @transform_5, window_bounds = array<i64: 2, 1, 32>}, {pipeline_mode = #tpu.pipeline_mode<synchronous>, transform_indices = @transform_6, window_bounds = array<i64: 2, 32, 128>}, {pipeline_mode = #tpu.pipeline_mode<synchronous>, transform_indices = @transform_7, window_bounds = array<i64: 2, 64, 32>}, {pipeline_mode = #tpu.pipeline_mode<synchronous>, transform_indices = @transform_8, window_bounds = array<i64: 1, 32>}, {pipeline_mode = #tpu.pipeline_mode<synchronous>, transform_indices = @transform_9, window_bounds = array<i64: 32, 2>}, {pipeline_mode = #tpu.pipeline_mode<synchronous>, transform_indices = @transform_10, window_bounds = array<i64: 1, 2>}, {transform_indices = @transform_11, window_bounds = array<i64: 1, 1, 2>}]} {
    %c0 = arith.constant 0 : index
    %c0_0 = arith.constant 0 : index
    %c0_1 = arith.constant 0 : index
    %0 = vector.load %arg1[%c0, %c0_0, %c0_1] : memref<1x8x32xf32, #tpu.memory_space<vmem>>, vector<1x8x32xf32>
    %1 = vector.shape_cast %0 : vector<1x8x32xf32> to vector<8x32xf32>
    %2 = arith.mulf %1, %1 : vector<8x32xf32>
    %cst = arith.constant dense<0.000000e+00> : vector<8xf32>
    %3 = vector.multi_reduction <add>, %2, %cst [1] : vector<8x32xf32> to vector<8xf32>
    %4 = vector.shape_cast %3 : vector<8xf32> to vector<8x1xf32>
    %cst_2 = arith.constant 3.200000e+01 : f32
    %5 = vector.broadcast %cst_2 : f32 to vector<8x1xf32>
    %6 = arith.divf %4, %5 : vector<8x1xf32>
    %cst_3 = arith.constant 9.99999997E-7 : f32
    %7 = vector.broadcast %cst_3 : f32 to vector<8x1xf32>
    %8 = arith.addf %6, %7 : vector<8x1xf32>
    %9 = math.rsqrt %8 : vector<8x1xf32>
    %10 = vector.broadcast %9 : vector<8x1xf32> to vector<8x32xf32>
    %11 = arith.mulf %1, %10 : vector<8x32xf32>
    %c0_4 = arith.constant 0 : index
    %c0_5 = arith.constant 0 : index
    %c0_6 = arith.constant 0 : index
    %12 = vector.load %arg3[%c0_4, %c0_5, %c0_6] : memref<2x1x32xf32, #tpu.memory_space<vmem>>, vector<1x1x32xf32>
    %13 = vector.shape_cast %12 : vector<1x1x32xf32> to vector<1x32xf32>
    %14 = vector.broadcast %13 : vector<1x32xf32> to vector<8x32xf32>
    %15 = arith.mulf %11, %14 : vector<8x32xf32>
    %16 = arith.truncf %15 : vector<8x32xf32> to vector<8x32xbf16>
    %c0_7 = arith.constant 0 : index
    %c0_8 = arith.constant 0 : index
    %c0_9 = arith.constant 0 : index
    %17 = vector.load %arg4[%c0_7, %c0_8, %c0_9] : memref<2x32x96xbf16, #tpu.memory_space<vmem>>, vector<1x32x96xbf16>
    %18 = vector.shape_cast %17 : vector<1x32x96xbf16> to vector<32x96xbf16>
    %cst_10 = arith.constant dense<0.000000e+00> : vector<8x96xf32>
    %19 = tpu.matmul %16, %18, %cst_10 {dimension_numbers = #tpu.dot_dimension_numbers<[1], [0], [0], [1], [0, 0, 1, 1], [], []>} : vector<8x32xbf16>, vector<32x96xbf16>, vector<8x96xf32> -> vector<8x96xf32>
    %20 = vector.extract_strided_slice %19 {offsets = [0, 0], sizes = [8, 8], strides = [1, 1]} : vector<8x96xf32> to vector<8x8xf32>
    %21 = arith.truncf %20 : vector<8x8xf32> to vector<8x8xbf16>
    %22 = vector.extract_strided_slice %19 {offsets = [0, 32], sizes = [8, 8], strides = [1, 1]} : vector<8x96xf32> to vector<8x8xf32>
    %23 = arith.truncf %22 : vector<8x8xf32> to vector<8x8xbf16>
    %24 = vector.extract_strided_slice %19 {offsets = [0, 64], sizes = [8, 8], strides = [1, 1]} : vector<8x96xf32> to vector<8x8xf32>
    %25 = arith.truncf %24 : vector<8x8xf32> to vector<8x8xbf16>
    "tpu.trace_start"() <{level = 10 : i32, message = "qd,kd->qk"}> : () -> ()
    %cst_11 = arith.constant dense<0.000000e+00> : vector<8x8xf32>
    %26 = tpu.matmul %21, %23, %cst_11 {dimension_numbers = #tpu.dot_dimension_numbers<[1], [1], [0], [0], [0, 0, 1, 0], [], []>} : vector<8x8xbf16>, vector<8x8xbf16>, vector<8x8xf32> -> vector<8x8xf32>
    "tpu.trace_stop"() : () -> ()
    %c0_12 = arith.constant 0 : index
    %c0_13 = arith.constant 0 : index
    %c0_14 = arith.constant 0 : index
    %c0_15 = arith.constant 0 : index
    %27 = vector.load %arg2[%c0_12, %c0_13, %c0_14, %c0_15] : memref<1x4x8x8xf32, #tpu.memory_space<vmem>>, vector<1x1x8x8xf32>
    %28 = vector.shape_cast %27 : vector<1x1x8x8xf32> to vector<8x8xf32>
    %29 = arith.addf %26, %28 : vector<8x8xf32>
    %cst_16 = arith.constant dense<0xFF800000> : vector<8xf32>
    %30 = vector.multi_reduction <maximumf>, %29, %cst_16 [1] : vector<8x8xf32> to vector<8xf32>
    %31 = vector.shape_cast %30 : vector<8xf32> to vector<8x1xf32>
    %32 = vector.broadcast %31 : vector<8x1xf32> to vector<8x8xf32>
    %33 = arith.subf %29, %32 : vector<8x8xf32>
    %34 = math.exp %33 : vector<8x8xf32>
    %cst_17 = arith.constant dense<0.000000e+00> : vector<8xf32>
    %35 = vector.multi_reduction <add>, %34, %cst_17 [1] : vector<8x8xf32> to vector<8xf32>
    %36 = vector.shape_cast %35 : vector<8xf32> to vector<8x1xf32>
    %cst_18 = arith.constant 9.99999971E-10 : f32
    %37 = vector.broadcast %cst_18 : f32 to vector<8x1xf32>
    %38 = arith.addf %36, %37 : vector<8x1xf32>
    %39 = tpu.reciprocal %38 {approx = true} : vector<8x1xf32> -> vector<8x1xf32>
    %40 = vector.broadcast %39 : vector<8x1xf32> to vector<8x8xf32>
    %41 = arith.mulf %34, %40 : vector<8x8xf32>
    %42 = arith.truncf %41 : vector<8x8xf32> to vector<8x8xbf16>
    %cst_19 = arith.constant dense<0.000000e+00> : vector<8x8xf32>
    %43 = tpu.matmul %42, %25, %cst_19 {dimension_numbers = #tpu.dot_dimension_numbers<[1], [0], [0], [1], [0, 0, 1, 1], [], []>} : vector<8x8xbf16>, vector<8x8xbf16>, vector<8x8xf32> -> vector<8x8xf32>
    %44 = vector.extract_strided_slice %19 {offsets = [0, 8], sizes = [8, 8], strides = [1, 1]} : vector<8x96xf32> to vector<8x8xf32>
    %45 = arith.truncf %44 : vector<8x8xf32> to vector<8x8xbf16>
    %46 = vector.extract_strided_slice %19 {offsets = [0, 40], sizes = [8, 8], strides = [1, 1]} : vector<8x96xf32> to vector<8x8xf32>
    %47 = arith.truncf %46 : vector<8x8xf32> to vector<8x8xbf16>
    %48 = vector.extract_strided_slice %19 {offsets = [0, 72], sizes = [8, 8], strides = [1, 1]} : vector<8x96xf32> to vector<8x8xf32>
    %49 = arith.truncf %48 : vector<8x8xf32> to vector<8x8xbf16>
    "tpu.trace_start"() <{level = 10 : i32, message = "qd,kd->qk"}> : () -> ()
    %cst_20 = arith.constant dense<0.000000e+00> : vector<8x8xf32>
    %50 = tpu.matmul %45, %47, %cst_20 {dimension_numbers = #tpu.dot_dimension_numbers<[1], [1], [0], [0], [0, 0, 1, 0], [], []>} : vector<8x8xbf16>, vector<8x8xbf16>, vector<8x8xf32> -> vector<8x8xf32>
    "tpu.trace_stop"() : () -> ()
    %c0_21 = arith.constant 0 : index
    %c1 = arith.constant 1 : index
    %c0_22 = arith.constant 0 : index
    %c0_23 = arith.constant 0 : index
    %51 = vector.load %arg2[%c0_21, %c1, %c0_22, %c0_23] : memref<1x4x8x8xf32, #tpu.memory_space<vmem>>, vector<1x1x8x8xf32>
    %52 = vector.shape_cast %51 : vector<1x1x8x8xf32> to vector<8x8xf32>
    %53 = arith.addf %50, %52 : vector<8x8xf32>
    %cst_24 = arith.constant dense<0xFF800000> : vector<8xf32>
    %54 = vector.multi_reduction <maximumf>, %53, %cst_24 [1] : vector<8x8xf32> to vector<8xf32>
    %55 = vector.shape_cast %54 : vector<8xf32> to vector<8x1xf32>
    %56 = vector.broadcast %55 : vector<8x1xf32> to vector<8x8xf32>
    %57 = arith.subf %53, %56 : vector<8x8xf32>
    %58 = math.exp %57 : vector<8x8xf32>
    %cst_25 = arith.constant dense<0.000000e+00> : vector<8xf32>
    %59 = vector.multi_reduction <add>, %58, %cst_25 [1] : vector<8x8xf32> to vector<8xf32>
    %60 = vector.shape_cast %59 : vector<8xf32> to vector<8x1xf32>
    %cst_26 = arith.constant 9.99999971E-10 : f32
    %61 = vector.broadcast %cst_26 : f32 to vector<8x1xf32>
    %62 = arith.addf %60, %61 : vector<8x1xf32>
    %63 = tpu.reciprocal %62 {approx = true} : vector<8x1xf32> -> vector<8x1xf32>
    %64 = vector.broadcast %63 : vector<8x1xf32> to vector<8x8xf32>
    %65 = arith.mulf %58, %64 : vector<8x8xf32>
    %66 = arith.truncf %65 : vector<8x8xf32> to vector<8x8xbf16>
    %cst_27 = arith.constant dense<0.000000e+00> : vector<8x8xf32>
    %67 = tpu.matmul %66, %49, %cst_27 {dimension_numbers = #tpu.dot_dimension_numbers<[1], [0], [0], [1], [0, 0, 1, 1], [], []>} : vector<8x8xbf16>, vector<8x8xbf16>, vector<8x8xf32> -> vector<8x8xf32>
    %68 = vector.extract_strided_slice %19 {offsets = [0, 16], sizes = [8, 8], strides = [1, 1]} : vector<8x96xf32> to vector<8x8xf32>
    %69 = arith.truncf %68 : vector<8x8xf32> to vector<8x8xbf16>
    %70 = vector.extract_strided_slice %19 {offsets = [0, 48], sizes = [8, 8], strides = [1, 1]} : vector<8x96xf32> to vector<8x8xf32>
    %71 = arith.truncf %70 : vector<8x8xf32> to vector<8x8xbf16>
    %72 = vector.extract_strided_slice %19 {offsets = [0, 80], sizes = [8, 8], strides = [1, 1]} : vector<8x96xf32> to vector<8x8xf32>
    %73 = arith.truncf %72 : vector<8x8xf32> to vector<8x8xbf16>
    "tpu.trace_start"() <{level = 10 : i32, message = "qd,kd->qk"}> : () -> ()
    %cst_28 = arith.constant dense<0.000000e+00> : vector<8x8xf32>
    %74 = tpu.matmul %69, %71, %cst_28 {dimension_numbers = #tpu.dot_dimension_numbers<[1], [1], [0], [0], [0, 0, 1, 0], [], []>} : vector<8x8xbf16>, vector<8x8xbf16>, vector<8x8xf32> -> vector<8x8xf32>
    "tpu.trace_stop"() : () -> ()
    %c0_29 = arith.constant 0 : index
    %c2 = arith.constant 2 : index
    %c0_30 = arith.constant 0 : index
    %c0_31 = arith.constant 0 : index
    %75 = vector.load %arg2[%c0_29, %c2, %c0_30, %c0_31] : memref<1x4x8x8xf32, #tpu.memory_space<vmem>>, vector<1x1x8x8xf32>
    %76 = vector.shape_cast %75 : vector<1x1x8x8xf32> to vector<8x8xf32>
    %77 = arith.addf %74, %76 : vector<8x8xf32>
    %cst_32 = arith.constant dense<0xFF800000> : vector<8xf32>
    %78 = vector.multi_reduction <maximumf>, %77, %cst_32 [1] : vector<8x8xf32> to vector<8xf32>
    %79 = vector.shape_cast %78 : vector<8xf32> to vector<8x1xf32>
    %80 = vector.broadcast %79 : vector<8x1xf32> to vector<8x8xf32>
    %81 = arith.subf %77, %80 : vector<8x8xf32>
    %82 = math.exp %81 : vector<8x8xf32>
    %cst_33 = arith.constant dense<0.000000e+00> : vector<8xf32>
    %83 = vector.multi_reduction <add>, %82, %cst_33 [1] : vector<8x8xf32> to vector<8xf32>
    %84 = vector.shape_cast %83 : vector<8xf32> to vector<8x1xf32>
    %cst_34 = arith.constant 9.99999971E-10 : f32
    %85 = vector.broadcast %cst_34 : f32 to vector<8x1xf32>
    %86 = arith.addf %84, %85 : vector<8x1xf32>
    %87 = tpu.reciprocal %86 {approx = true} : vector<8x1xf32> -> vector<8x1xf32>
    %88 = vector.broadcast %87 : vector<8x1xf32> to vector<8x8xf32>
    %89 = arith.mulf %82, %88 : vector<8x8xf32>
    %90 = arith.truncf %89 : vector<8x8xf32> to vector<8x8xbf16>
    %cst_35 = arith.constant dense<0.000000e+00> : vector<8x8xf32>
    %91 = tpu.matmul %90, %73, %cst_35 {dimension_numbers = #tpu.dot_dimension_numbers<[1], [0], [0], [1], [0, 0, 1, 1], [], []>} : vector<8x8xbf16>, vector<8x8xbf16>, vector<8x8xf32> -> vector<8x8xf32>
    %92 = vector.extract_strided_slice %19 {offsets = [0, 24], sizes = [8, 8], strides = [1, 1]} : vector<8x96xf32> to vector<8x8xf32>
    %93 = arith.truncf %92 : vector<8x8xf32> to vector<8x8xbf16>
    %94 = vector.extract_strided_slice %19 {offsets = [0, 56], sizes = [8, 8], strides = [1, 1]} : vector<8x96xf32> to vector<8x8xf32>
    %95 = arith.truncf %94 : vector<8x8xf32> to vector<8x8xbf16>
    %96 = vector.extract_strided_slice %19 {offsets = [0, 88], sizes = [8, 8], strides = [1, 1]} : vector<8x96xf32> to vector<8x8xf32>
    %97 = arith.truncf %96 : vector<8x8xf32> to vector<8x8xbf16>
    "tpu.trace_start"() <{level = 10 : i32, message = "qd,kd->qk"}> : () -> ()
    %cst_36 = arith.constant dense<0.000000e+00> : vector<8x8xf32>
    %98 = tpu.matmul %93, %95, %cst_36 {dimension_numbers = #tpu.dot_dimension_numbers<[1], [1], [0], [0], [0, 0, 1, 0], [], []>} : vector<8x8xbf16>, vector<8x8xbf16>, vector<8x8xf32> -> vector<8x8xf32>
    "tpu.trace_stop"() : () -> ()
    %c0_37 = arith.constant 0 : index
    %c3 = arith.constant 3 : index
    %c0_38 = arith.constant 0 : index
    %c0_39 = arith.constant 0 : index
    %99 = vector.load %arg2[%c0_37, %c3, %c0_38, %c0_39] : memref<1x4x8x8xf32, #tpu.memory_space<vmem>>, vector<1x1x8x8xf32>
    %100 = vector.shape_cast %99 : vector<1x1x8x8xf32> to vector<8x8xf32>
    %101 = arith.addf %98, %100 : vector<8x8xf32>
    %cst_40 = arith.constant dense<0xFF800000> : vector<8xf32>
    %102 = vector.multi_reduction <maximumf>, %101, %cst_40 [1] : vector<8x8xf32> to vector<8xf32>
    %103 = vector.shape_cast %102 : vector<8xf32> to vector<8x1xf32>
    %104 = vector.broadcast %103 : vector<8x1xf32> to vector<8x8xf32>
    %105 = arith.subf %101, %104 : vector<8x8xf32>
    %106 = math.exp %105 : vector<8x8xf32>
    %cst_41 = arith.constant dense<0.000000e+00> : vector<8xf32>
    %107 = vector.multi_reduction <add>, %106, %cst_41 [1] : vector<8x8xf32> to vector<8xf32>
    %108 = vector.shape_cast %107 : vector<8xf32> to vector<8x1xf32>
    %cst_42 = arith.constant 9.99999971E-10 : f32
    %109 = vector.broadcast %cst_42 : f32 to vector<8x1xf32>
    %110 = arith.addf %108, %109 : vector<8x1xf32>
    %111 = tpu.reciprocal %110 {approx = true} : vector<8x1xf32> -> vector<8x1xf32>
    %112 = vector.broadcast %111 : vector<8x1xf32> to vector<8x8xf32>
    %113 = arith.mulf %106, %112 : vector<8x8xf32>
    %114 = arith.truncf %113 : vector<8x8xf32> to vector<8x8xbf16>
    %cst_43 = arith.constant dense<0.000000e+00> : vector<8x8xf32>
    %115 = tpu.matmul %114, %97, %cst_43 {dimension_numbers = #tpu.dot_dimension_numbers<[1], [0], [0], [1], [0, 0, 1, 1], [], []>} : vector<8x8xbf16>, vector<8x8xbf16>, vector<8x8xf32> -> vector<8x8xf32>
    %116 = tpu.concatenate %43, %67, %91, %115 in 1 : vector<8x8xf32>, vector<8x8xf32>, vector<8x8xf32>, vector<8x8xf32> -> vector<8x32xf32>
    %117 = arith.truncf %116 : vector<8x32xf32> to vector<8x32xbf16>
    %c0_44 = arith.constant 0 : index
    %c0_45 = arith.constant 0 : index
    %c0_46 = arith.constant 0 : index
    %118 = vector.load %arg5[%c0_44, %c0_45, %c0_46] : memref<2x32x32xbf16, #tpu.memory_space<vmem>>, vector<1x32x32xbf16>
    %119 = vector.shape_cast %118 : vector<1x32x32xbf16> to vector<32x32xbf16>
    %cst_47 = arith.constant dense<0.000000e+00> : vector<8x32xf32>
    %120 = tpu.matmul %117, %119, %cst_47 {dimension_numbers = #tpu.dot_dimension_numbers<[1], [0], [0], [1], [0, 0, 1, 1], [], []>} : vector<8x32xbf16>, vector<32x32xbf16>, vector<8x32xf32> -> vector<8x32xf32>
    %121 = arith.addf %1, %120 : vector<8x32xf32>
    %122 = arith.mulf %121, %121 : vector<8x32xf32>
    %cst_48 = arith.constant dense<0.000000e+00> : vector<8xf32>
    %123 = vector.multi_reduction <add>, %122, %cst_48 [1] : vector<8x32xf32> to vector<8xf32>
    %124 = vector.shape_cast %123 : vector<8xf32> to vector<8x1xf32>
    %cst_49 = arith.constant 3.200000e+01 : f32
    %125 = vector.broadcast %cst_49 : f32 to vector<8x1xf32>
    %126 = arith.divf %124, %125 : vector<8x1xf32>
    %cst_50 = arith.constant 9.99999997E-7 : f32
    %127 = vector.broadcast %cst_50 : f32 to vector<8x1xf32>
    %128 = arith.addf %126, %127 : vector<8x1xf32>
    %129 = math.rsqrt %128 : vector<8x1xf32>
    %130 = vector.broadcast %129 : vector<8x1xf32> to vector<8x32xf32>
    %131 = arith.mulf %121, %130 : vector<8x32xf32>
    %c0_51 = arith.constant 0 : index
    %c0_52 = arith.constant 0 : index
    %c0_53 = arith.constant 0 : index
    %132 = vector.load %arg6[%c0_51, %c0_52, %c0_53] : memref<2x1x32xf32, #tpu.memory_space<vmem>>, vector<1x1x32xf32>
    %133 = vector.shape_cast %132 : vector<1x1x32xf32> to vector<1x32xf32>
    %134 = vector.broadcast %133 : vector<1x32xf32> to vector<8x32xf32>
    %135 = arith.mulf %131, %134 : vector<8x32xf32>
    %136 = arith.truncf %135 : vector<8x32xf32> to vector<8x32xbf16>
    %c0_54 = arith.constant 0 : index
    %c0_55 = arith.constant 0 : index
    %c0_56 = arith.constant 0 : index
    %137 = vector.load %arg7[%c0_54, %c0_55, %c0_56] : memref<2x32x128xbf16, #tpu.memory_space<vmem>>, vector<1x32x128xbf16>
    %138 = vector.shape_cast %137 : vector<1x32x128xbf16> to vector<32x128xbf16>
    %cst_57 = arith.constant dense<0.000000e+00> : vector<8x128xf32>
    %139 = tpu.matmul %136, %138, %cst_57 {dimension_numbers = #tpu.dot_dimension_numbers<[1], [0], [0], [1], [0, 0, 1, 1], [], []>} : vector<8x32xbf16>, vector<32x128xbf16>, vector<8x128xf32> -> vector<8x128xf32>
    %140 = vector.extract_strided_slice %139 {offsets = [0, 0], sizes = [8, 64], strides = [1, 1]} : vector<8x128xf32> to vector<8x64xf32>
    %141 = arith.mulf %140, %140 : vector<8x64xf32>
    %142 = arith.mulf %140, %141 : vector<8x64xf32>
    %cst_58 = arith.constant 4.471500e-02 : f32
    %143 = vector.broadcast %cst_58 : f32 to vector<8x64xf32>
    %144 = arith.mulf %143, %142 : vector<8x64xf32>
    %145 = arith.addf %140, %144 : vector<8x64xf32>
    %cst_59 = arith.constant 0.797884583 : f32
    %146 = vector.broadcast %cst_59 : f32 to vector<8x64xf32>
    %147 = arith.mulf %146, %145 : vector<8x64xf32>
    %148 = math.tanh %147 : vector<8x64xf32>
    %cst_60 = arith.constant 1.000000e+00 : f32
    %149 = vector.broadcast %cst_60 : f32 to vector<8x64xf32>
    %150 = arith.addf %149, %148 : vector<8x64xf32>
    %cst_61 = arith.constant 5.000000e-01 : f32
    %151 = vector.broadcast %cst_61 : f32 to vector<8x64xf32>
    %152 = arith.mulf %151, %150 : vector<8x64xf32>
    %153 = arith.mulf %140, %152 : vector<8x64xf32>
    %154 = vector.extract_strided_slice %139 {offsets = [0, 64], sizes = [8, 64], strides = [1, 1]} : vector<8x128xf32> to vector<8x64xf32>
    %155 = arith.mulf %153, %154 : vector<8x64xf32>
    %156 = arith.truncf %155 : vector<8x64xf32> to vector<8x64xbf16>
    %c0_62 = arith.constant 0 : index
    %c0_63 = arith.constant 0 : index
    %c0_64 = arith.constant 0 : index
    %157 = vector.load %arg8[%c0_62, %c0_63, %c0_64] : memref<2x64x32xbf16, #tpu.memory_space<vmem>>, vector<1x64x32xbf16>
    %158 = vector.shape_cast %157 : vector<1x64x32xbf16> to vector<64x32xbf16>
    %cst_65 = arith.constant dense<0.000000e+00> : vector<8x32xf32>
    %159 = tpu.matmul %156, %158, %cst_65 {dimension_numbers = #tpu.dot_dimension_numbers<[1], [0], [0], [1], [0, 0, 1, 1], [], []>} : vector<8x64xbf16>, vector<64x32xbf16>, vector<8x32xf32> -> vector<8x32xf32>
    %160 = arith.addf %121, %159 : vector<8x32xf32>
    %161 = arith.mulf %160, %160 : vector<8x32xf32>
    %cst_66 = arith.constant dense<0.000000e+00> : vector<8xf32>
    %162 = vector.multi_reduction <add>, %161, %cst_66 [1] : vector<8x32xf32> to vector<8xf32>
    %163 = vector.shape_cast %162 : vector<8xf32> to vector<8x1xf32>
    %cst_67 = arith.constant 3.200000e+01 : f32
    %164 = vector.broadcast %cst_67 : f32 to vector<8x1xf32>
    %165 = arith.divf %163, %164 : vector<8x1xf32>
    %cst_68 = arith.constant 9.99999997E-7 : f32
    %166 = vector.broadcast %cst_68 : f32 to vector<8x1xf32>
    %167 = arith.addf %165, %166 : vector<8x1xf32>
    %168 = math.rsqrt %167 : vector<8x1xf32>
    %169 = vector.broadcast %168 : vector<8x1xf32> to vector<8x32xf32>
    %170 = arith.mulf %160, %169 : vector<8x32xf32>
    %c1_69 = arith.constant 1 : index
    %c0_70 = arith.constant 0 : index
    %c0_71 = arith.constant 0 : index
    %171 = vector.load %arg3[%c1_69, %c0_70, %c0_71] : memref<2x1x32xf32, #tpu.memory_space<vmem>>, vector<1x1x32xf32>
    %172 = vector.shape_cast %171 : vector<1x1x32xf32> to vector<1x32xf32>
    %173 = vector.broadcast %172 : vector<1x32xf32> to vector<8x32xf32>
    %174 = arith.mulf %170, %173 : vector<8x32xf32>
    %175 = arith.truncf %174 : vector<8x32xf32> to vector<8x32xbf16>
    %c1_72 = arith.constant 1 : index
    %c0_73 = arith.constant 0 : index
    %c0_74 = arith.constant 0 : index
    %176 = vector.load %arg4[%c1_72, %c0_73, %c0_74] : memref<2x32x96xbf16, #tpu.memory_space<vmem>>, vector<1x32x96xbf16>
    %177 = vector.shape_cast %176 : vector<1x32x96xbf16> to vector<32x96xbf16>
    %cst_75 = arith.constant dense<0.000000e+00> : vector<8x96xf32>
    %178 = tpu.matmul %175, %177, %cst_75 {dimension_numbers = #tpu.dot_dimension_numbers<[1], [0], [0], [1], [0, 0, 1, 1], [], []>} : vector<8x32xbf16>, vector<32x96xbf16>, vector<8x96xf32> -> vector<8x96xf32>
    %179 = vector.extract_strided_slice %178 {offsets = [0, 0], sizes = [8, 8], strides = [1, 1]} : vector<8x96xf32> to vector<8x8xf32>
    %180 = arith.truncf %179 : vector<8x8xf32> to vector<8x8xbf16>
    %181 = vector.extract_strided_slice %178 {offsets = [0, 32], sizes = [8, 8], strides = [1, 1]} : vector<8x96xf32> to vector<8x8xf32>
    %182 = arith.truncf %181 : vector<8x8xf32> to vector<8x8xbf16>
    %183 = vector.extract_strided_slice %178 {offsets = [0, 64], sizes = [8, 8], strides = [1, 1]} : vector<8x96xf32> to vector<8x8xf32>
    %184 = arith.truncf %183 : vector<8x8xf32> to vector<8x8xbf16>
    "tpu.trace_start"() <{level = 10 : i32, message = "qd,kd->qk"}> : () -> ()
    %cst_76 = arith.constant dense<0.000000e+00> : vector<8x8xf32>
    %185 = tpu.matmul %180, %182, %cst_76 {dimension_numbers = #tpu.dot_dimension_numbers<[1], [1], [0], [0], [0, 0, 1, 0], [], []>} : vector<8x8xbf16>, vector<8x8xbf16>, vector<8x8xf32> -> vector<8x8xf32>
    "tpu.trace_stop"() : () -> ()
    %c0_77 = arith.constant 0 : index
    %c0_78 = arith.constant 0 : index
    %c0_79 = arith.constant 0 : index
    %c0_80 = arith.constant 0 : index
    %186 = vector.load %arg2[%c0_77, %c0_78, %c0_79, %c0_80] : memref<1x4x8x8xf32, #tpu.memory_space<vmem>>, vector<1x1x8x8xf32>
    %187 = vector.shape_cast %186 : vector<1x1x8x8xf32> to vector<8x8xf32>
    %188 = arith.addf %185, %187 : vector<8x8xf32>
    %cst_81 = arith.constant dense<0xFF800000> : vector<8xf32>
    %189 = vector.multi_reduction <maximumf>, %188, %cst_81 [1] : vector<8x8xf32> to vector<8xf32>
    %190 = vector.shape_cast %189 : vector<8xf32> to vector<8x1xf32>
    %191 = vector.broadcast %190 : vector<8x1xf32> to vector<8x8xf32>
    %192 = arith.subf %188, %191 : vector<8x8xf32>
    %193 = math.exp %192 : vector<8x8xf32>
    %cst_82 = arith.constant dense<0.000000e+00> : vector<8xf32>
    %194 = vector.multi_reduction <add>, %193, %cst_82 [1] : vector<8x8xf32> to vector<8xf32>
    %195 = vector.shape_cast %194 : vector<8xf32> to vector<8x1xf32>
    %cst_83 = arith.constant 9.99999971E-10 : f32
    %196 = vector.broadcast %cst_83 : f32 to vector<8x1xf32>
    %197 = arith.addf %195, %196 : vector<8x1xf32>
    %198 = tpu.reciprocal %197 {approx = true} : vector<8x1xf32> -> vector<8x1xf32>
    %199 = vector.broadcast %198 : vector<8x1xf32> to vector<8x8xf32>
    %200 = arith.mulf %193, %199 : vector<8x8xf32>
    %201 = arith.truncf %200 : vector<8x8xf32> to vector<8x8xbf16>
    %cst_84 = arith.constant dense<0.000000e+00> : vector<8x8xf32>
    %202 = tpu.matmul %201, %184, %cst_84 {dimension_numbers = #tpu.dot_dimension_numbers<[1], [0], [0], [1], [0, 0, 1, 1], [], []>} : vector<8x8xbf16>, vector<8x8xbf16>, vector<8x8xf32> -> vector<8x8xf32>
    %203 = vector.extract_strided_slice %178 {offsets = [0, 8], sizes = [8, 8], strides = [1, 1]} : vector<8x96xf32> to vector<8x8xf32>
    %204 = arith.truncf %203 : vector<8x8xf32> to vector<8x8xbf16>
    %205 = vector.extract_strided_slice %178 {offsets = [0, 40], sizes = [8, 8], strides = [1, 1]} : vector<8x96xf32> to vector<8x8xf32>
    %206 = arith.truncf %205 : vector<8x8xf32> to vector<8x8xbf16>
    %207 = vector.extract_strided_slice %178 {offsets = [0, 72], sizes = [8, 8], strides = [1, 1]} : vector<8x96xf32> to vector<8x8xf32>
    %208 = arith.truncf %207 : vector<8x8xf32> to vector<8x8xbf16>
    "tpu.trace_start"() <{level = 10 : i32, message = "qd,kd->qk"}> : () -> ()
    %cst_85 = arith.constant dense<0.000000e+00> : vector<8x8xf32>
    %209 = tpu.matmul %204, %206, %cst_85 {dimension_numbers = #tpu.dot_dimension_numbers<[1], [1], [0], [0], [0, 0, 1, 0], [], []>} : vector<8x8xbf16>, vector<8x8xbf16>, vector<8x8xf32> -> vector<8x8xf32>
    "tpu.trace_stop"() : () -> ()
    %c0_86 = arith.constant 0 : index
    %c1_87 = arith.constant 1 : index
    %c0_88 = arith.constant 0 : index
    %c0_89 = arith.constant 0 : index
    %210 = vector.load %arg2[%c0_86, %c1_87, %c0_88, %c0_89] : memref<1x4x8x8xf32, #tpu.memory_space<vmem>>, vector<1x1x8x8xf32>
    %211 = vector.shape_cast %210 : vector<1x1x8x8xf32> to vector<8x8xf32>
    %212 = arith.addf %209, %211 : vector<8x8xf32>
    %cst_90 = arith.constant dense<0xFF800000> : vector<8xf32>
    %213 = vector.multi_reduction <maximumf>, %212, %cst_90 [1] : vector<8x8xf32> to vector<8xf32>
    %214 = vector.shape_cast %213 : vector<8xf32> to vector<8x1xf32>
    %215 = vector.broadcast %214 : vector<8x1xf32> to vector<8x8xf32>
    %216 = arith.subf %212, %215 : vector<8x8xf32>
    %217 = math.exp %216 : vector<8x8xf32>
    %cst_91 = arith.constant dense<0.000000e+00> : vector<8xf32>
    %218 = vector.multi_reduction <add>, %217, %cst_91 [1] : vector<8x8xf32> to vector<8xf32>
    %219 = vector.shape_cast %218 : vector<8xf32> to vector<8x1xf32>
    %cst_92 = arith.constant 9.99999971E-10 : f32
    %220 = vector.broadcast %cst_92 : f32 to vector<8x1xf32>
    %221 = arith.addf %219, %220 : vector<8x1xf32>
    %222 = tpu.reciprocal %221 {approx = true} : vector<8x1xf32> -> vector<8x1xf32>
    %223 = vector.broadcast %222 : vector<8x1xf32> to vector<8x8xf32>
    %224 = arith.mulf %217, %223 : vector<8x8xf32>
    %225 = arith.truncf %224 : vector<8x8xf32> to vector<8x8xbf16>
    %cst_93 = arith.constant dense<0.000000e+00> : vector<8x8xf32>
    %226 = tpu.matmul %225, %208, %cst_93 {dimension_numbers = #tpu.dot_dimension_numbers<[1], [0], [0], [1], [0, 0, 1, 1], [], []>} : vector<8x8xbf16>, vector<8x8xbf16>, vector<8x8xf32> -> vector<8x8xf32>
    %227 = vector.extract_strided_slice %178 {offsets = [0, 16], sizes = [8, 8], strides = [1, 1]} : vector<8x96xf32> to vector<8x8xf32>
    %228 = arith.truncf %227 : vector<8x8xf32> to vector<8x8xbf16>
    %229 = vector.extract_strided_slice %178 {offsets = [0, 48], sizes = [8, 8], strides = [1, 1]} : vector<8x96xf32> to vector<8x8xf32>
    %230 = arith.truncf %229 : vector<8x8xf32> to vector<8x8xbf16>
    %231 = vector.extract_strided_slice %178 {offsets = [0, 80], sizes = [8, 8], strides = [1, 1]} : vector<8x96xf32> to vector<8x8xf32>
    %232 = arith.truncf %231 : vector<8x8xf32> to vector<8x8xbf16>
    "tpu.trace_start"() <{level = 10 : i32, message = "qd,kd->qk"}> : () -> ()
    %cst_94 = arith.constant dense<0.000000e+00> : vector<8x8xf32>
    %233 = tpu.matmul %228, %230, %cst_94 {dimension_numbers = #tpu.dot_dimension_numbers<[1], [1], [0], [0], [0, 0, 1, 0], [], []>} : vector<8x8xbf16>, vector<8x8xbf16>, vector<8x8xf32> -> vector<8x8xf32>
    "tpu.trace_stop"() : () -> ()
    %c0_95 = arith.constant 0 : index
    %c2_96 = arith.constant 2 : index
    %c0_97 = arith.constant 0 : index
    %c0_98 = arith.constant 0 : index
    %234 = vector.load %arg2[%c0_95, %c2_96, %c0_97, %c0_98] : memref<1x4x8x8xf32, #tpu.memory_space<vmem>>, vector<1x1x8x8xf32>
    %235 = vector.shape_cast %234 : vector<1x1x8x8xf32> to vector<8x8xf32>
    %236 = arith.addf %233, %235 : vector<8x8xf32>
    %cst_99 = arith.constant dense<0xFF800000> : vector<8xf32>
    %237 = vector.multi_reduction <maximumf>, %236, %cst_99 [1] : vector<8x8xf32> to vector<8xf32>
    %238 = vector.shape_cast %237 : vector<8xf32> to vector<8x1xf32>
    %239 = vector.broadcast %238 : vector<8x1xf32> to vector<8x8xf32>
    %240 = arith.subf %236, %239 : vector<8x8xf32>
    %241 = math.exp %240 : vector<8x8xf32>
    %cst_100 = arith.constant dense<0.000000e+00> : vector<8xf32>
    %242 = vector.multi_reduction <add>, %241, %cst_100 [1] : vector<8x8xf32> to vector<8xf32>
    %243 = vector.shape_cast %242 : vector<8xf32> to vector<8x1xf32>
    %cst_101 = arith.constant 9.99999971E-10 : f32
    %244 = vector.broadcast %cst_101 : f32 to vector<8x1xf32>
    %245 = arith.addf %243, %244 : vector<8x1xf32>
    %246 = tpu.reciprocal %245 {approx = true} : vector<8x1xf32> -> vector<8x1xf32>
    %247 = vector.broadcast %246 : vector<8x1xf32> to vector<8x8xf32>
    %248 = arith.mulf %241, %247 : vector<8x8xf32>
    %249 = arith.truncf %248 : vector<8x8xf32> to vector<8x8xbf16>
    %cst_102 = arith.constant dense<0.000000e+00> : vector<8x8xf32>
    %250 = tpu.matmul %249, %232, %cst_102 {dimension_numbers = #tpu.dot_dimension_numbers<[1], [0], [0], [1], [0, 0, 1, 1], [], []>} : vector<8x8xbf16>, vector<8x8xbf16>, vector<8x8xf32> -> vector<8x8xf32>
    %251 = vector.extract_strided_slice %178 {offsets = [0, 24], sizes = [8, 8], strides = [1, 1]} : vector<8x96xf32> to vector<8x8xf32>
    %252 = arith.truncf %251 : vector<8x8xf32> to vector<8x8xbf16>
    %253 = vector.extract_strided_slice %178 {offsets = [0, 56], sizes = [8, 8], strides = [1, 1]} : vector<8x96xf32> to vector<8x8xf32>
    %254 = arith.truncf %253 : vector<8x8xf32> to vector<8x8xbf16>
    %255 = vector.extract_strided_slice %178 {offsets = [0, 88], sizes = [8, 8], strides = [1, 1]} : vector<8x96xf32> to vector<8x8xf32>
    %256 = arith.truncf %255 : vector<8x8xf32> to vector<8x8xbf16>
    "tpu.trace_start"() <{level = 10 : i32, message = "qd,kd->qk"}> : () -> ()
    %cst_103 = arith.constant dense<0.000000e+00> : vector<8x8xf32>
    %257 = tpu.matmul %252, %254, %cst_103 {dimension_numbers = #tpu.dot_dimension_numbers<[1], [1], [0], [0], [0, 0, 1, 0], [], []>} : vector<8x8xbf16>, vector<8x8xbf16>, vector<8x8xf32> -> vector<8x8xf32>
    "tpu.trace_stop"() : () -> ()
    %c0_104 = arith.constant 0 : index
    %c3_105 = arith.constant 3 : index
    %c0_106 = arith.constant 0 : index
    %c0_107 = arith.constant 0 : index
    %258 = vector.load %arg2[%c0_104, %c3_105, %c0_106, %c0_107] : memref<1x4x8x8xf32, #tpu.memory_space<vmem>>, vector<1x1x8x8xf32>
    %259 = vector.shape_cast %258 : vector<1x1x8x8xf32> to vector<8x8xf32>
    %260 = arith.addf %257, %259 : vector<8x8xf32>
    %cst_108 = arith.constant dense<0xFF800000> : vector<8xf32>
    %261 = vector.multi_reduction <maximumf>, %260, %cst_108 [1] : vector<8x8xf32> to vector<8xf32>
    %262 = vector.shape_cast %261 : vector<8xf32> to vector<8x1xf32>
    %263 = vector.broadcast %262 : vector<8x1xf32> to vector<8x8xf32>
    %264 = arith.subf %260, %263 : vector<8x8xf32>
    %265 = math.exp %264 : vector<8x8xf32>
    %cst_109 = arith.constant dense<0.000000e+00> : vector<8xf32>
    %266 = vector.multi_reduction <add>, %265, %cst_109 [1] : vector<8x8xf32> to vector<8xf32>
    %267 = vector.shape_cast %266 : vector<8xf32> to vector<8x1xf32>
    %cst_110 = arith.constant 9.99999971E-10 : f32
    %268 = vector.broadcast %cst_110 : f32 to vector<8x1xf32>
    %269 = arith.addf %267, %268 : vector<8x1xf32>
    %270 = tpu.reciprocal %269 {approx = true} : vector<8x1xf32> -> vector<8x1xf32>
    %271 = vector.broadcast %270 : vector<8x1xf32> to vector<8x8xf32>
    %272 = arith.mulf %265, %271 : vector<8x8xf32>
    %273 = arith.truncf %272 : vector<8x8xf32> to vector<8x8xbf16>
    %cst_111 = arith.constant dense<0.000000e+00> : vector<8x8xf32>
    %274 = tpu.matmul %273, %256, %cst_111 {dimension_numbers = #tpu.dot_dimension_numbers<[1], [0], [0], [1], [0, 0, 1, 1], [], []>} : vector<8x8xbf16>, vector<8x8xbf16>, vector<8x8xf32> -> vector<8x8xf32>
    %275 = tpu.concatenate %202, %226, %250, %274 in 1 : vector<8x8xf32>, vector<8x8xf32>, vector<8x8xf32>, vector<8x8xf32> -> vector<8x32xf32>
    %276 = arith.truncf %275 : vector<8x32xf32> to vector<8x32xbf16>
    %c1_112 = arith.constant 1 : index
    %c0_113 = arith.constant 0 : index
    %c0_114 = arith.constant 0 : index
    %277 = vector.load %arg5[%c1_112, %c0_113, %c0_114] : memref<2x32x32xbf16, #tpu.memory_space<vmem>>, vector<1x32x32xbf16>
    %278 = vector.shape_cast %277 : vector<1x32x32xbf16> to vector<32x32xbf16>
    %cst_115 = arith.constant dense<0.000000e+00> : vector<8x32xf32>
    %279 = tpu.matmul %276, %278, %cst_115 {dimension_numbers = #tpu.dot_dimension_numbers<[1], [0], [0], [1], [0, 0, 1, 1], [], []>} : vector<8x32xbf16>, vector<32x32xbf16>, vector<8x32xf32> -> vector<8x32xf32>
    %280 = arith.addf %160, %279 : vector<8x32xf32>
    %281 = arith.mulf %280, %280 : vector<8x32xf32>
    %cst_116 = arith.constant dense<0.000000e+00> : vector<8xf32>
    %282 = vector.multi_reduction <add>, %281, %cst_116 [1] : vector<8x32xf32> to vector<8xf32>
    %283 = vector.shape_cast %282 : vector<8xf32> to vector<8x1xf32>
    %cst_117 = arith.constant 3.200000e+01 : f32
    %284 = vector.broadcast %cst_117 : f32 to vector<8x1xf32>
    %285 = arith.divf %283, %284 : vector<8x1xf32>
    %cst_118 = arith.constant 9.99999997E-7 : f32
    %286 = vector.broadcast %cst_118 : f32 to vector<8x1xf32>
    %287 = arith.addf %285, %286 : vector<8x1xf32>
    %288 = math.rsqrt %287 : vector<8x1xf32>
    %289 = vector.broadcast %288 : vector<8x1xf32> to vector<8x32xf32>
    %290 = arith.mulf %280, %289 : vector<8x32xf32>
    %c1_119 = arith.constant 1 : index
    %c0_120 = arith.constant 0 : index
    %c0_121 = arith.constant 0 : index
    %291 = vector.load %arg6[%c1_119, %c0_120, %c0_121] : memref<2x1x32xf32, #tpu.memory_space<vmem>>, vector<1x1x32xf32>
    %292 = vector.shape_cast %291 : vector<1x1x32xf32> to vector<1x32xf32>
    %293 = vector.broadcast %292 : vector<1x32xf32> to vector<8x32xf32>
    %294 = arith.mulf %290, %293 : vector<8x32xf32>
    %295 = arith.truncf %294 : vector<8x32xf32> to vector<8x32xbf16>
    %c1_122 = arith.constant 1 : index
    %c0_123 = arith.constant 0 : index
    %c0_124 = arith.constant 0 : index
    %296 = vector.load %arg7[%c1_122, %c0_123, %c0_124] : memref<2x32x128xbf16, #tpu.memory_space<vmem>>, vector<1x32x128xbf16>
    %297 = vector.shape_cast %296 : vector<1x32x128xbf16> to vector<32x128xbf16>
    %cst_125 = arith.constant dense<0.000000e+00> : vector<8x128xf32>
    %298 = tpu.matmul %295, %297, %cst_125 {dimension_numbers = #tpu.dot_dimension_numbers<[1], [0], [0], [1], [0, 0, 1, 1], [], []>} : vector<8x32xbf16>, vector<32x128xbf16>, vector<8x128xf32> -> vector<8x128xf32>
    %299 = vector.extract_strided_slice %298 {offsets = [0, 0], sizes = [8, 64], strides = [1, 1]} : vector<8x128xf32> to vector<8x64xf32>
    %300 = arith.mulf %299, %299 : vector<8x64xf32>
    %301 = arith.mulf %299, %300 : vector<8x64xf32>
    %cst_126 = arith.constant 4.471500e-02 : f32
    %302 = vector.broadcast %cst_126 : f32 to vector<8x64xf32>
    %303 = arith.mulf %302, %301 : vector<8x64xf32>
    %304 = arith.addf %299, %303 : vector<8x64xf32>
    %cst_127 = arith.constant 0.797884583 : f32
    %305 = vector.broadcast %cst_127 : f32 to vector<8x64xf32>
    %306 = arith.mulf %305, %304 : vector<8x64xf32>
    %307 = math.tanh %306 : vector<8x64xf32>
    %cst_128 = arith.constant 1.000000e+00 : f32
    %308 = vector.broadcast %cst_128 : f32 to vector<8x64xf32>
    %309 = arith.addf %308, %307 : vector<8x64xf32>
    %cst_129 = arith.constant 5.000000e-01 : f32
    %310 = vector.broadcast %cst_129 : f32 to vector<8x64xf32>
    %311 = arith.mulf %310, %309 : vector<8x64xf32>
    %312 = arith.mulf %299, %311 : vector<8x64xf32>
    %313 = vector.extract_strided_slice %298 {offsets = [0, 64], sizes = [8, 64], strides = [1, 1]} : vector<8x128xf32> to vector<8x64xf32>
    %314 = arith.mulf %312, %313 : vector<8x64xf32>
    %315 = arith.truncf %314 : vector<8x64xf32> to vector<8x64xbf16>
    %c1_130 = arith.constant 1 : index
    %c0_131 = arith.constant 0 : index
    %c0_132 = arith.constant 0 : index
    %316 = vector.load %arg8[%c1_130, %c0_131, %c0_132] : memref<2x64x32xbf16, #tpu.memory_space<vmem>>, vector<1x64x32xbf16>
    %317 = vector.shape_cast %316 : vector<1x64x32xbf16> to vector<64x32xbf16>
    %cst_133 = arith.constant dense<0.000000e+00> : vector<8x32xf32>
    %318 = tpu.matmul %315, %317, %cst_133 {dimension_numbers = #tpu.dot_dimension_numbers<[1], [0], [0], [1], [0, 0, 1, 1], [], []>} : vector<8x64xbf16>, vector<64x32xbf16>, vector<8x32xf32> -> vector<8x32xf32>
    %319 = arith.addf %280, %318 : vector<8x32xf32>
    %320 = vector.extract_strided_slice %319 {offsets = [0, 0], sizes = [1, 32], strides = [1, 1]} : vector<8x32xf32> to vector<1x32xf32>
    %321 = arith.mulf %320, %320 : vector<1x32xf32>
    %cst_134 = arith.constant dense<0.000000e+00> : vector<1xf32>
    %322 = vector.multi_reduction <add>, %321, %cst_134 [1] : vector<1x32xf32> to vector<1xf32>
    %323 = vector.shape_cast %322 : vector<1xf32> to vector<1x1xf32>
    %cst_135 = arith.constant 3.200000e+01 : f32
    %324 = vector.broadcast %cst_135 : f32 to vector<1x1xf32>
    %325 = arith.divf %323, %324 : vector<1x1xf32>
    %cst_136 = arith.constant 9.99999997E-7 : f32
    %326 = vector.broadcast %cst_136 : f32 to vector<1x1xf32>
    %327 = arith.addf %325, %326 : vector<1x1xf32>
    %328 = math.rsqrt %327 : vector<1x1xf32>
    %329 = vector.broadcast %328 : vector<1x1xf32> to vector<1x32xf32>
    %330 = arith.mulf %320, %329 : vector<1x32xf32>
    %c0_137 = arith.constant 0 : index
    %c0_138 = arith.constant 0 : index
    %331 = vector.load %arg9[%c0_137, %c0_138] : memref<1x32xf32, #tpu.memory_space<vmem>>, vector<1x32xf32>
    %332 = arith.mulf %330, %331 : vector<1x32xf32>
    %333 = arith.truncf %332 : vector<1x32xf32> to vector<1x32xbf16>
    %c0_139 = arith.constant 0 : index
    %c0_140 = arith.constant 0 : index
    %334 = vector.load %arg10[%c0_139, %c0_140] : memref<32x2xbf16, #tpu.memory_space<vmem>>, vector<32x2xbf16>
    %cst_141 = arith.constant dense<0.000000e+00> : vector<1x2xf32>
    %335 = tpu.matmul %333, %334, %cst_141 {dimension_numbers = #tpu.dot_dimension_numbers<[1], [0], [0], [1], [0, 0, 1, 1], [], []>} : vector<1x32xbf16>, vector<32x2xbf16>, vector<1x2xf32> -> vector<1x2xf32>
    %c0_142 = arith.constant 0 : index
    %c0_143 = arith.constant 0 : index
    %336 = vector.load %arg11[%c0_142, %c0_143] : memref<1x2xf32, #tpu.memory_space<vmem>>, vector<1x2xf32>
    %337 = arith.addf %335, %336 : vector<1x2xf32>
    %338 = vector.shape_cast %337 : vector<1x2xf32> to vector<1x1x2xf32>
    %c0_144 = arith.constant 0 : index
    %c0_145 = arith.constant 0 : index
    %c0_146 = arith.constant 0 : index
    %339 = vector.load %arg12[%c0_144, %c0_145, %c0_146] : memref<1x1x2xf32, #tpu.memory_space<vmem>>, vector<1x1x2xf32>
    tpu.vector_store %arg12[%c0_144, %c0_145, %c0_146], %338 {strides = array<i32>} : memref<1x1x2xf32, #tpu.memory_space<vmem>>, vector<1x1x2xf32>,
    return
  }
  func.func @transform_0(%arg0: i32) -> (i32, i32, i32) {
    %c0_i32 = arith.constant 0 : i32
    %c0_i32_0 = arith.constant 0 : i32
    %c0_i32_1 = arith.constant 0 : i32
    return %arg0, %c0_i32, %c0_i32_0 : i32, i32, i32
  }
  func.func @transform_1(%arg0: i32) -> (i32, i32, i32, i32) {
    %c0_i32 = arith.constant 0 : i32
    %c0_i32_0 = arith.constant 0 : i32
    %c0_i32_1 = arith.constant 0 : i32
    %c0_i32_2 = arith.constant 0 : i32
    return %arg0, %c0_i32, %c0_i32_0, %c0_i32_1 : i32, i32, i32, i32
  }
  func.func @transform_2(%arg0: i32) -> (i32, i32, i32) {
    %c0_i32 = arith.constant 0 : i32
    %c0_i32_0 = arith.constant 0 : i32
    %c0_i32_1 = arith.constant 0 : i32
    %c0_i32_2 = arith.constant 0 : i32
    return %c0_i32, %c0_i32_0, %c0_i32_1 : i32, i32, i32
  }
  func.func @transform_3(%arg0: i32) -> (i32, i32, i32) {
    %c0_i32 = arith.constant 0 : i32
    %c0_i32_0 = arith.constant 0 : i32
    %c0_i32_1 = arith.constant 0 : i32
    %c0_i32_2 = arith.constant 0 : i32
    return %c0_i32, %c0_i32_0, %c0_i32_1 : i32, i32, i32
  }
  func.func @transform_4(%arg0: i32) -> (i32, i32, i32) {
    %c0_i32 = arith.constant 0 : i32
    %c0_i32_0 = arith.constant 0 : i32
    %c0_i32_1 = arith.constant 0 : i32
    %c0_i32_2 = arith.constant 0 : i32
    return %c0_i32, %c0_i32_0, %c0_i32_1 : i32, i32, i32
  }
  func.func @transform_5(%arg0: i32) -> (i32, i32, i32) {
    %c0_i32 = arith.constant 0 : i32
    %c0_i32_0 = arith.constant 0 : i32
    %c0_i32_1 = arith.constant 0 : i32
    %c0_i32_2 = arith.constant 0 : i32
    return %c0_i32, %c0_i32_0, %c0_i32_1 : i32, i32, i32
  }
  func.func @transform_6(%arg0: i32) -> (i32, i32, i32) {
    %c0_i32 = arith.constant 0 : i32
    %c0_i32_0 = arith.constant 0 : i32
    %c0_i32_1 = arith.constant 0 : i32
    %c0_i32_2 = arith.constant 0 : i32
    return %c0_i32, %c0_i32_0, %c0_i32_1 : i32, i32, i32
  }
  func.func @transform_7(%arg0: i32) -> (i32, i32, i32) {
    %c0_i32 = arith.constant 0 : i32
    %c0_i32_0 = arith.constant 0 : i32
    %c0_i32_1 = arith.constant 0 : i32
    %c0_i32_2 = arith.constant 0 : i32
    return %c0_i32, %c0_i32_0, %c0_i32_1 : i32, i32, i32
  }
  func.func @transform_8(%arg0: i32) -> (i32, i32) {
    %c0_i32 = arith.constant 0 : i32
    %c0_i32_0 = arith.constant 0 : i32
    %c0_i32_1 = arith.constant 0 : i32
    return %c0_i32, %c0_i32_0 : i32, i32
  }
  func.func @transform_9(%arg0: i32) -> (i32, i32) {
    %c0_i32 = arith.constant 0 : i32
    %c0_i32_0 = arith.constant 0 : i32
    %c0_i32_1 = arith.constant 0 : i32
    return %c0_i32, %c0_i32_0 : i32, i32
  }
  func.func @transform_10(%arg0: i32) -> (i32, i32) {
    %c0_i32 = arith.constant 0 : i32
    %c0_i32_0 = arith.constant 0 : i32
    %c0_i32_1 = arith.constant 0 : i32
    return %c0_i32, %c0_i32_0 : i32, i32
  }
  func.func @transform_11(%arg0: i32) -> (i32, i32, i32) {
    %c0_i32 = arith.constant 0 : i32
    %c0_i32_0 = arith.constant 0 : i32
    %c0_i32_1 = arith.constant 0 : i32
    return %arg0, %c0_i32, %c0_i32_0 : i32, i32, i32
  }
}

</mosaic_0001>

<bundles_post_ra>
// kernel: mt5_classifier_forward.1
= control target key start
LH: loop header
LB: loop body
LE: loop exit
PB: predicated region body
PF: predicated region fallthrough
CT: control target
= control target key end

     0   :  { %s2590_s17 = smov 0   ;;  %s2940_s0 = inlined_call_operand.vmem [shape: f32[2,8,32], index: 0, kind: input, shape index: {}]   ;;  %s2941_s1 = inlined_call_operand.vmem [shape: f32[2,4,8,8], index: 1, kind: input, shape index: {}]   ;;  %s2942_s2 = inlined_call_operand.vmem [shape: f32[2,1,32], index: 2, kind: input, shape index: {}]   ;;  %s2943_s3 = inlined_call_operand.vmem [shape: bf16[2,32,96], index: 3, kind: input, shape index: {}]   ;;  %s2944_s4 = inlined_call_operand.vmem [shape: bf16[2,32,32], index: 4, kind: input, shape index: {}]   ;;  %s2945_s5 = inlined_call_operand.vmem [shape: f32[2,1,32], index: 5, kind: input, shape index: {}]   ;;  %s2946_s6 = inlined_call_operand.vmem [shape: bf16[2,32,128], index: 6, kind: input, shape index: {}]   ;;  %s2947_s7 = inlined_call_operand.vmem [shape: bf16[2,64,32], index: 7, kind: input, shape index: {}]   ;;  %s2948_s8 = inlined_call_operand.vmem [shape: f32[1,32], index: 8, kind: input, shape index: {}]   ;;  %s2949_s9 = inlined_call_operand.vmem [shape: bf16[32,2], index: 9, kind: input, shape index: {}]   ;;  %s2950_s10 = inlined_call_operand.vmem [shape: f32[1,2], index: 10, kind: input, shape index: {}]   ;;  %s2951_s11 = inlined_call_operand.vmem [shape: f32[2,1,2], index: 11, kind: output, shape index: {}]  }
   0x1 LB: > { %s2085_s18 = sadd.s32 4294967295, %s2512_s17   ;;  %p2089_p0 = scmp.ge.s32.totalorder %s2512_s17, 1  ;;  %s2512_s17 = sphi %s2590_s17, %s21_s17  }
   0x2   : > { %p346_p1 = scmp.lt.s32.totalorder %s2512_s17, 3 }
   0x4   : > { %p347_p2 = pnand %p2089_p0, %p346_p1 }
   0x5   : > { %p388_p3 = scmp.lt.s32.totalorder (!%p347_p2), %s2085_s18, 1  ;;  %vm403_vm0 = vcmask (!%p347_p2), 261120   ;;  %v2438_v3 = vld [vmem:[%s2943_s3] sm:$0xff] (!%p347_p2)   ;;  %v2514_v4 = vmov (!%p347_p2), 0.0   ;;  %vm2515_vm1 = vmmov (!%p347_p2), 0   ;;  %v2439_v5 = vld [vmem:[%s2943_s3 + $0x8] sm:$0xff] (!%p347_p2)  }
   0x6   : > { %350 = sbr.rel (%p347_p2) target bundleno = 5100 (0x13ec), region = 64  ;;  %2238 = vmatprep.subr.bf16.mxu0 (!%p347_p2), %v2514_v4  ;;  %2242 = vmatprep.mubr.msk.bf16.mxu0 (!%p347_p2), %vm2515_vm1, %v2514_v4  ;;  %v2093_v10 = vld [vmem:[%s2942_s2] ss:$0 sm:$0xff] (!%p347_p2)  ;;  %s2516_s29 = smov (!%p347_p2), 88   ;;  %vm485_vm2 = vcmask (!%p347_p2), 64512   ;;  %vm550_vm3 = vcmask (!%p347_p2), 1043456  }
   0x7   : > { %2239 = vmatpush3.bf16.msra.mxu0 (!%p347_p2), %v2438_v3  ;;  %2246 = vmatprep.subr.bf16.mxu1 (!%p347_p2), %v2514_v4  ;;  %s2517_s30 = smov (!%p347_p2), 96   ;;  %s2518_s12 = smov (!%p347_p2), 120   ;;  %vm946_vm4 = vcmask (!%p347_p2), 130048   ;;  %vm948_vm5 = vcmask (!%p347_p2), 195584   ;;  %vm1134_vm6 = vcmask (!%p347_p2), 523264   ;;  %vm1953_vm7 = vcmask (!%p347_p2), 253952  }
   0x8   : > { %2240 = vmatprep.subr.bf16.mxu0 (!%p347_p2), %v2514_v4  ;;  %2248 = vmatprep.mubr.msk.bf16.mxu1 (!%p347_p2), %vm2515_vm1, %v2514_v4  ;;  %s2519_s13 = smov (!%p347_p2), 80   ;;  %s2520_s14 = smov (!%p347_p2), 112   ;;  %vm2024_vm8 = vcmask (!%p347_p2), 8192  }
   0x9   : > { %s2521_s15 = smov (!%p347_p2), 72   ;;  %s2522_s16 = smov (!%p347_p2), 104  }
   0xa   : > { %s2523_s23 = smov (!%p347_p2), 56   ;;  %s2524_s24 = smov (!%p347_p2), 64  }
   0xb   : > { %2241 = vmatpush3.bf16.msra.mxu0 (!%p347_p2), %v2439_v5  ;;  %s2955_s25 = smov (!%p347_p2), 40   ;;  %s2526_s26 = smov (!%p347_p2), 48  }
   0xc   : > { %2252 = vmatprep.subr.bf16.mxu0 (!%p347_p2), %v2514_v4  ;;  %s2954_s27 = smov (!%p347_p2), 8   ;;  %s2952_s28 = smov (!%p347_p2), 24  }
   0xd   : > { %s2961_s18 = smov (!%p388_p3, %s2085_s18), 1 }
   0xe   : > { %s2090_s19 = sshll.u32 %s2961_s18, 3 }
   0xf   : > { %s391_s22 = scalar_lea.vmem %s2940_s0, %s2090_s19  ;;  %s2174_s19 = sshll.u32 %s2961_s18, 5 }
  0x10   : > { %v2604_v0 = vld [vmem:[%s391_s22] sm:$0xff]  ;;  %s396_s22 = scalar_lea.vmem %s2941_s1, %s2174_s19 }
  0x11   : > { %v402_v1 = vmul.f32 %v2604_v0, %v2604_v0  ;;  %v2671_v30 = vld [vmem:[%s396_s22] sm:$0xff]  ;;  %v2675_v37 = vld [vmem:[%s396_s22 + $0x8] sm:$0xff]  ;;  %v2679_v44 = vld [vmem:[%s396_s22 + $0x10] sm:$0xff] }
  0x12   : > { %v2683_v51 = vld [vmem:[%s396_s22 + $0x18] sm:$0xff]  ;;  %s2953_s22 = smov 16  }
  0x13   : > { %v404_v2 = vsel %vm403_vm0, %v402_v1, 0.0 }
  0x14   : > { %405 = vadd.xlane.f32.xlu0 %v404_v2 }
  0xa1   : > { %v406_v6 = vpop.xlane.xlu0 %405 }
  0xa2   : > { %v408_v7 = vmul.f32 0.03125, %v406_v6 }
  0xa4   : > { %v409_v8 = vadd.f32 1e-06, %v408_v7 }
  0xa6   : > { %2460 = vrsqrt.f32 %v409_v8 }
  0xb0   : > { %v2461_v9 = vpop.eup %2460 }
  0xb1   : > { %v411_v11 = vmul.f32 %v2461_v9, %v2604_v0 }
  0xb3   : > { %v419_v12 = vmul.f32 %v2093_v10, %v411_v11 }
  0xb5   : > { %v420_v13 = vpack.c.bf16 %v419_v12, %v419_v12 }
  0xb7   : > { %2243 = vmatmul.mubr.msk.bf16.vlgmr.msra.gmra.mrb[0].mxu0 %vm403_vm0, %v420_v13 }
  0xb8   : > { %2254 = vmatprep.mubr.msk.bf16.mxu0 %vm2515_vm1, %v2514_v4 }
 0x18a   : > { %v474_v14 = vpop.f32.mrb[0].mxu0 }
 0x18b   : > { %v2630_v15 = vpack.c.bf16 %v474_v14, %v474_v14  ;;  %v2244_v16 = vpop.f32.mrb[1].mxu0 }
 0x18c   : > { %v477_v17 = vpop.f32.mrb[2].mxu0 }
 0x18d   : > { %598 = vrot.lane.b32.xlu1 %v2630_v15, %s2516_s29  ;;  %483 = vrot.lane.b32.xlu0 %v2630_v15, %s2517_s30  ;;  %v2245_v18 = vpop.f32.mrb[3].mxu0 }
 0x191   : > { %596 = vrot.lane.b32.xlu1 %v2630_v15, %s2518_s12 }
 0x195   : > { %711 = vrot.lane.b32.xlu1 %v2630_v15, %s2519_s13 }
 0x199   : > { %709 = vrot.lane.b32.xlu1 %v2630_v15, %s2520_s14 }
 0x19d   : > { %824 = vrot.lane.b32.xlu1 %v2630_v15, %s2521_s15 }
 0x1a1   : > { %822 = vrot.lane.b32.xlu1 %v2630_v15, %s2522_s16 }
 0x1ff   : > { %v599_v19 = vpop.permute.xlu1 %598  ;;  %v484_v20 = vpop.permute.xlu0 %483 }
 0x200   : > { %v490_v21 = vsel %vm485_vm2, %v484_v20, 0  ;;  %v604_v23 = vsel %vm485_vm2, %v599_v19, 0 }
 0x201   : > { %2247 = vmatpush3.bf16.xpose.msra.mxu1 %v490_v21 }
 0x202   : > { %2258 = vmatprep.subr.bf16.mxu1 %v2514_v4 }
 0x203   : > { %v597_v22 = vpop.permute.xlu1 %596 }
 0x207   : > { %v712_v24 = vpop.permute.xlu1 %711 }
 0x208   : > { %2249 = vmatmul.mubr.msk.bf16.vlgmr.msra.gmra.mrb[0].mxu1 %vm485_vm2, %v2630_v15  ;;  %v717_v26 = vsel %vm485_vm2, %v712_v24, 0 }
 0x209   : > { %2259 = vmatpush3.bf16.xpose.msra.mxu1 %v604_v23  ;;  %2260 = vmatprep.mubr.msk.bf16.mxu1 %vm2515_vm1, %v2514_v4 }
 0x20a   : > { %2270 = vmatprep.subr.bf16.mxu1 %v2514_v4 }
 0x20b   : > { %v710_v25 = vpop.permute.xlu1 %709 }
 0x20f   : > { %v825_v27 = vpop.permute.xlu1 %824 }
 0x210   : > { %2261 = vmatmul.mubr.msk.bf16.vlgmr.msra.gmra.mrb[4].mxu1 %vm485_vm2, %v597_v22  ;;  %v830_v28 = vsel %vm485_vm2, %v825_v27, 0 }
 0x211   : > { %2271 = vmatpush3.bf16.xpose.msra.mxu1 %v717_v26  ;;  %2272 = vmatprep.mubr.msk.bf16.mxu1 %vm2515_vm1, %v2514_v4 }
 0x212   : > { %2282 = vmatprep.subr.bf16.mxu1 %v2514_v4 }
 0x213   : > { %v823_v29 = vpop.permute.xlu1 %822 }
 0x218   : > { %2273 = vmatmul.mubr.msk.bf16.vlgmr.msra.gmra.mrb[8].mxu1 %vm485_vm2, %v710_v25 }
 0x219   : > { %2283 = vmatpush3.bf16.xpose.msra.mxu1 %v830_v28  ;;  %2284 = vmatprep.mubr.msk.bf16.mxu1 %vm2515_vm1, %v2514_v4 }
 0x21a   : > { %2294 = vmatprep.subr.bf16.mxu1 %v2514_v4 }
 0x220   : > { %2285 = vmatmul.mubr.msk.bf16.vlgmr.msra.gmra.mrb[12].mxu1 %vm485_vm2, %v823_v29 }
 0x221   : > { %2298 = vmatprep.mubr.msk.bf16.mxu1 %vm2515_vm1, %v2514_v4 }
 0x2db   : > { %v526_v31 = vpop.f32.mrb[0].mxu1 }
 0x2dc   : > { %v527_v32 = vadd.f32 %v526_v31, %v2671_v30  ;;  %v2250_v33 = vpop.f32.mrb[1].mxu1 }
 0x2dd   : > { %v529_v34 = vpop.f32.mrb[2].mxu1 }
 0x2de   : > { %v2251_v35 = vpop.f32.mrb[3].mxu1  ;;  %v532_v36 = vsel %vm485_vm2, %v527_v32, -inf }
 0x2df   : > { %533 = vmax.xlane.f32.xlu1 %v532_v36 }
 0x2e3   : > { %v640_v38 = vpop.f32.mrb[4].mxu1 }
 0x2e4   : > { %v641_v39 = vadd.f32 %v2675_v37, %v640_v38  ;;  %v2262_v40 = vpop.f32.mrb[5].mxu1 }
 0x2e5   : > { %v643_v41 = vpop.f32.mrb[6].mxu1 }
 0x2e6   : > { %v2263_v42 = vpop.f32.mrb[7].mxu1  ;;  %v646_v43 = vsel %vm485_vm2, %v641_v39, -inf }
 0x2e7   : > { %647 = vmax.xlane.f32.xlu0 %v646_v43 }
 0x2eb   : > { %v753_v45 = vpop.f32.mrb[8].mxu1 }
 0x2ec   : > { %v754_v46 = vadd.f32 %v2679_v44, %v753_v45  ;;  %v2274_v47 = vpop.f32.mrb[9].mxu1 }
 0x2ed   : > { %v756_v48 = vpop.f32.mrb[10].mxu1 }
 0x2ee   : > { %v2275_v49 = vpop.f32.mrb[11].mxu1  ;;  %v759_v50 = vsel %vm485_vm2, %v754_v46, -inf }
 0x2ef   : > { %760 = vmax.xlane.f32.xlu0 %v759_v50 }
 0x2f3   : > { %v866_v52 = vpop.f32.mrb[12].mxu1 }
 0x2f4   : > { %v867_v53 = vadd.f32 %v2683_v51, %v866_v52  ;;  %v2286_v54 = vpop.f32.mrb[13].mxu1 }
 0x2f5   : > { %v869_v55 = vpop.f32.mrb[14].mxu1 }
 0x2f6   : > { %v2287_v56 = vpop.f32.mrb[15].mxu1  ;;  %v872_v57 = vsel %vm485_vm2, %v867_v53, -inf }
 0x2f7   : > { %873 = vmax.xlane.f32.xlu1 %v872_v57  ;;  %v2440_v56 = vld [vmem:[%s2944_s4] sm:$0xff]   ;;  %v2441_v57 = vld [vmem:[%s2944_s4 + $0x8] sm:$0xff]  }
 0x2f8   : > { %2295 = vmatpush3.bf16.msra.mxu1 %v2440_v56 }
 0x2f9   : > { %2296 = vmatprep.subr.bf16.mxu1 %v2514_v4 }
 0x2fc   : > { %2297 = vmatpush3.bf16.msra.mxu1 %v2441_v57 }
 0x2fd   : > { %2310 = vmatprep.subr.bf16.mxu1 %v2514_v4 }
 0x36c   : > { %v534_v58 = vpop.xlane.xlu1 %533 }
 0x36d   : > { %v535_v59 = vsub.f32 %v527_v32, %v534_v58 }
 0x36f   : > { %v536_v60 = vmul.f32 1.442695, %v535_v59 }
 0x371   : > { %2462 = vpow2.f32 %v536_v60 }
 0x374   : > { %v648_v61 = vpop.xlane.xlu0 %647 }
 0x375   : > { %v649_v62 = vsub.f32 %v641_v39, %v648_v61 }
 0x377   : > { %v650_v63 = vmul.f32 1.442695, %v649_v62 }
 0x379   : > { %2464 = vpow2.f32 %v650_v63 }
 0x37b   : > { %v2463_v1 = vpop.eup %2462 }
 0x37c   : > { %v761_v2 = vpop.xlane.xlu0 %760  ;;  %v538_v3 = vsel %vm485_vm2, %v2463_v1, 0.0 }
 0x37d   : > { %v762_v5 = vsub.f32 %v754_v46, %v761_v2  ;;  %539 = vadd.xlane.f32.xlu0 %v538_v3 }
 0x37f   : > { %v763_v6 = vmul.f32 1.442695, %v762_v5 }
 0x381   : > { %2466 = vpow2.f32 %v763_v6 }
 0x383   : > { %v2465_v7 = vpop.eup %2464 }
 0x384   : > { %v652_v8 = vsel %vm485_vm2, %v2465_v7, 0.0  ;;  %v874_v11 = vpop.xlane.xlu1 %873 }
 0x385   : > { %653 = vadd.xlane.f32.xlu1 %v652_v8  ;;  %v875_v12 = vsub.f32 %v867_v53, %v874_v11 }
 0x387   : > { %v876_v13 = vmul.f32 1.442695, %v875_v12 }
 0x389   : > { %2468 = vpow2.f32 %v876_v13 }
 0x38b   : > { %v2467_v9 = vpop.eup %2466 }
 0x38c   : > { %v765_v10 = vsel %vm485_vm2, %v2467_v9, 0.0 }
 0x38d   : > { %766 = vadd.xlane.f32.xlu0 %v765_v10 }
 0x393   : > { %v2469_v14 = vpop.eup %2468 }
 0x394   : > { %v878_v16 = vsel %vm485_vm2, %v2469_v14, 0.0 }
 0x396   : > { %659 = vrot.lane.b32.xlu1 %v2630_v15, %s2523_s23 }
 0x3a3   : > { %545 = vrot.lane.b32.xlu0 %v2630_v15, %s2524_s24 }
 0x3a7   : > { %885 = vrot.lane.b32.xlu0 %v2630_v15, %s2955_s25 }
 0x3ba   : > { %879 = vadd.xlane.f32.xlu1 %v878_v16 }
 0x3cb   : > { %772 = vrot.lane.b32.xlu1 %v2630_v15, %s2526_s26 }
 0x40a   : > { %v540_v17 = vpop.xlane.xlu0 %539 }
 0x40b   : > { %v541_v18 = vadd.f32 1e-09, %v540_v17 }
 0x40d   : > { %2470 = vrcp.f32 %v541_v18 }
 0x412   : > { %v654_v19 = vpop.xlane.xlu1 %653 }
 0x413   : > { %v655_v20 = vadd.f32 1e-09, %v654_v19  ;;  %v2442_v19 = vld [vmem:[%s2946_s6] sm:$0xff]  }
 0x415   : > { %2472 = vrcp.f32 %v655_v20  ;;  %v2443_v20 = vld [vmem:[%s2946_s6 + $0x8] sm:$0xff]  }
 0x416   : > { %v660_v26 = vpop.permute.xlu1 %659 }
 0x417   : > { %v2471_v21 = vpop.eup %2470  ;;  %v665_v15 = vsel %vm550_vm3, %v660_v26, 0 }
 0x418   : > { %v543_v23 = vmul.f32 %v2471_v21, %v2463_v1 }
 0x41a   : > { %v767_v22 = vpop.xlane.xlu0 %766  ;;  %v544_v27 = vpack.c.bf16 %v543_v23, %v543_v23 }
 0x41b   : > { %v768_v32 = vadd.f32 1e-09, %v767_v22 }
 0x41d   : > { %2474 = vrcp.f32 %v768_v32 }
 0x41e   : > { %v546_v24 = vpop.permute.xlu0 %545 }
 0x41f   : > { %v552_v25 = vsel %vm550_vm3, %v546_v24, 0  ;;  %v2473_v28 = vpop.eup %2472  ;;  %v2111_v24 = vld [vmem:[%s2945_s5] ss:$0 sm:$0xff] }
 0x420   : > { %2253 = vmatpush3.bf16.msra.mxu0 %v552_v25  ;;  %v657_v29 = vmul.f32 %v2473_v28, %v2465_v7  ;;  %v2444_v28 = vld [vmem:[%s2947_s7] sm:$0xff]  }
 0x421   : > { %2264 = vmatprep.subr.bf16.mxu0 %v2514_v4 }
 0x422   : > { %v658_v31 = vpack.c.bf16 %v657_v29, %v657_v29  ;;  %v886_v40 = vpop.permute.xlu0 %885  ;;  %v2446_v29 = vld [vmem:[%s2947_s7 + $0x10] sm:$0xff]  }
 0x423   : > { %2255 = vmatmul.mubr.msk.bf16.vlgmr.msra.gmra.mrb[4].mxu0 %vm485_vm2, %v544_v27  ;;  %v891_v42 = vsel %vm550_vm3, %v886_v40, 0 }
 0x424   : > { %2265 = vmatpush3.bf16.msra.mxu0 %v665_v15  ;;  %2266 = vmatprep.mubr.msk.bf16.mxu0 %vm2515_vm1, %v2514_v4  ;;  %v2445_v15 = vld [vmem:[%s2947_s7 + $0x8] sm:$0xff]  }
 0x425   : > { %2276 = vmatprep.subr.bf16.mxu0 %v2514_v4 }
 0x427   : > { %v2475_v33 = vpop.eup %2474 }
 0x428   : > { %v770_v36 = vmul.f32 %v2475_v33, %v2467_v9 }
 0x42a   : > { %v771_v41 = vpack.c.bf16 %v770_v36, %v770_v36 }
 0x42b   : > { %2267 = vmatmul.mubr.msk.bf16.vlgmr.msra.gmra.mrb[8].mxu0 %vm485_vm2, %v658_v31  ;;  %v2447_v31 = vld [vmem:[%s2947_s7 + $0x18] sm:$0xff]  }
 0x42c   : > { %2278 = vmatprep.mubr.msk.bf16.mxu0 %vm2515_vm1, %v2514_v4 }
 0x447   : > { %v880_v34 = vpop.xlane.xlu1 %879 }
 0x448   : > { %v881_v35 = vadd.f32 1e-09, %v880_v34 }
 0x44a   : > { %2476 = vrcp.f32 %v881_v35 }
 0x44b   : > { %v773_v38 = vpop.permute.xlu1 %772 }
 0x44c   : > { %v778_v39 = vsel %vm550_vm3, %v773_v38, 0 }
 0x44d   : > { %2277 = vmatpush3.bf16.msra.mxu0 %v778_v39 }
 0x44e   : > { %2288 = vmatprep.subr.bf16.mxu0 %v2514_v4 }
 0x450   : > { %2279 = vmatmul.mubr.msk.bf16.vlgmr.msra.gmra.mrb[12].mxu0 %vm485_vm2, %v771_v41 }
 0x451   : > { %2289 = vmatpush3.bf16.msra.mxu0 %v891_v42  ;;  %2290 = vmatprep.mubr.msk.bf16.mxu0 %vm2515_vm1, %v2514_v4 }
 0x452   : > { %2302 = vmatprep.subr.bf16.mxu0 %v2514_v4 }
 0x454   : > { %v2477_v43 = vpop.eup %2476 }
 0x455   : > { %v883_v45 = vmul.f32 %v2477_v43, %v2469_v14 }
 0x457   : > { %v884_v46 = vpack.c.bf16 %v883_v45, %v883_v45 }
 0x459   : > { %2291 = vmatmul.mubr.msk.bf16.vlgmr.msra.gmra.mrb[16].mxu0 %vm485_vm2, %v884_v46 }
 0x45a   : > { %2306 = vmatprep.mubr.msk.bf16.mxu0 %vm2515_vm1, %v2514_v4  ;;  %2303 = vmatpush3.bf16.msra.mxu0 %v2442_v19 }
 0x45b   : > { %2304 = vmatprep.subr.bf16.mxu0 %v2514_v4 }
 0x45e   : > { %2305 = vmatpush3.bf16.msra.mxu0 %v2443_v20 }
 0x45f   : > { %2322 = vmatprep.subr.bf16.mxu0 %v2514_v4 }
 0x4f6   : > { %v588_v47 = vpop.f32.mrb[4].mxu0 }
 0x4f7   : > { %v2256_v48 = vpop.f32.mrb[5].mxu0 }
 0x4f8   : > { %v591_v49 = vpop.f32.mrb[6].mxu0 }
 0x4f9   : > { %v2257_v50 = vpop.f32.mrb[7].mxu0 }
 0x4fe   : > { %v701_v52 = vpop.f32.mrb[8].mxu0 }
 0x4ff   : > { %934 = vrot.lane.b32.xlu1 %v701_v52, %s2954_s27  ;;  %v2268_v53 = vpop.f32.mrb[9].mxu0 }
 0x500   : > { %v704_v54 = vpop.f32.mrb[10].mxu0 }
 0x501   : > { %v2269_v55 = vpop.f32.mrb[11].mxu0 }
 0x523   : > { %v814_v58 = vpop.f32.mrb[12].mxu0 }
 0x524   : > { %938 = vrot.lane.b32.xlu0 %v814_v58, %s2953_s22  ;;  %v2280_v59 = vpop.f32.mrb[13].mxu0  ;;  %v2448_v58 = vld [vmem:[%s2943_s3 + $0x10] sm:$0xff]   ;;  %s399_s22 = scalar_lea.vmem %s2951_s11, %s2961_s18 }
 0x525   : > { %v817_v60 = vpop.f32.mrb[14].mxu0  ;;  %v2449_v59 = vld [vmem:[%s2943_s3 + $0x18] sm:$0xff]  }
 0x526   : > { %v2281_v61 = vpop.f32.mrb[15].mxu0 }
 0x52c   : > { %v927_v62 = vpop.f32.mrb[16].mxu0 }
 0x52d   : > { %942 = vrot.lane.b32.xlu1 %v927_v62, %s2952_s28  ;;  %v2292_v63 = vpop.f32.mrb[17].mxu0 }
 0x52e   : > { %v930_v1 = vpop.f32.mrb[18].mxu0 }
 0x52f   : > { %v2293_v2 = vpop.f32.mrb[19].mxu0  ;;  %v2121_v1 = vld [vmem:[%s2942_s2 + $0x1] ss:$0 sm:$0xff] }
 0x571   : > { %v935_v3 = vpop.permute.xlu1 %934 }
 0x572   : > { %v945_v6 = vsel %vm485_vm2, %v588_v47, %v935_v3 }
 0x596   : > { %v939_v5 = vpop.permute.xlu0 %938 }
 0x597   : > { %v947_v7 = vsel %vm946_vm4, %v945_v6, %v939_v5 }
 0x59f   : > { %v943_v8 = vpop.permute.xlu1 %942 }
 0x5a0   : > { %v949_v9 = vsel %vm948_vm5, %v947_v7, %v943_v8 }
 0x5a1   : > { %v950_v10 = vpack.c.bf16 %v949_v9, %v949_v9 }
 0x5a3   : > { %2299 = vmatmul.mubr.msk.bf16.vlgmr.msra.gmra.mrb[16].mxu1 %vm403_vm0, %v950_v10 }
 0x5a4   : > { %2318 = vmatprep.mubr.msk.bf16.mxu1 %vm2515_vm1, %v2514_v4  ;;  %2311 = vmatpush3.bf16.msra.mxu1 %v2444_v28 }
 0x5a5   : > { %2312 = vmatprep.subr.bf16.mxu1 %v2514_v4 }
 0x5a8   : > { %2313 = vmatpush3.bf16.msra.mxu1 %v2445_v15 }
 0x5a9   : > { %2314 = vmatprep.subr.bf16.mxu1 %v2514_v4 }
 0x5ac   : > { %2315 = vmatpush3.bf16.msra.mxu1 %v2446_v29 }
 0x5ad   : > { %2316 = vmatprep.subr.bf16.mxu1 %v2514_v4 }
 0x5b0   : > { %2317 = vmatpush3.bf16.msra.mxu1 %v2447_v31 }
 0x5b1   : > { %2336 = vmatprep.subr.bf16.mxu1 %v2514_v4 }
 0x676   : > { %v1004_v11 = vpop.f32.mrb[16].mxu1 }
 0x677   : > { %v1010_v12 = vadd.f32 %v1004_v11, %v2604_v0  ;;  %v2300_v13 = vpop.f32.mrb[17].mxu1 }
 0x678   : > { %v1007_v14 = vpop.f32.mrb[18].mxu1 }
 0x679   : > { %v2301_v16 = vpop.f32.mrb[19].mxu1  ;;  %v1011_v17 = vmul.f32 %v1010_v12, %v1010_v12 }
 0x67b   : > { %v1012_v18 = vsel %vm403_vm0, %v1011_v17, 0.0 }
 0x67c   : > { %1013 = vadd.xlane.f32.xlu0 %v1012_v18 }
 0x709   : > { %v1014_v0 = vpop.xlane.xlu0 %1013 }
 0x70a   : > { %v1015_v21 = vmul.f32 0.03125, %v1014_v0 }
 0x70c   : > { %v1016_v22 = vadd.f32 1e-06, %v1015_v21 }
 0x70e   : > { %2478 = vrsqrt.f32 %v1016_v22 }
 0x718   : > { %v2479_v23 = vpop.eup %2478 }
 0x719   : > { %v1018_v25 = vmul.f32 %v2479_v23, %v1010_v12 }
 0x71b   : > { %v1026_v26 = vmul.f32 %v2111_v24, %v1018_v25 }
 0x71d   : > { %v1027_v27 = vpack.c.bf16 %v1026_v26, %v1026_v26 }
 0x71f   : > { %2307 = vmatmul.mubr.msk.bf16.vlgmr.msra.gmra.mrb[20].mxu0 %vm403_vm0, %v1027_v27 }
 0x720   : > { %2326 = vmatprep.mubr.msk.bf16.mxu0 %vm2515_vm1, %v2514_v4  ;;  %2323 = vmatpush3.bf16.msra.mxu0 %v2448_v58 }
 0x721   : > { %2324 = vmatprep.subr.bf16.mxu0 %v2514_v4 }
 0x724   : > { %2325 = vmatpush3.bf16.msra.mxu0 %v2449_v59 }
 0x725   : > { %2330 = vmatprep.subr.bf16.mxu0 %v2514_v4 }
 0x7f2   : > { %v1081_v32 = vpop.f32.mrb[20].mxu0 }
 0x7f3   : > { %1097 = vrot.lane.b32.xlu1 %v1081_v32, %s2524_s24  ;;  %v2308_v33 = vpop.f32.mrb[21].mxu0  ;;  %v1087_v36 = vmul.f32 %v1081_v32, %v1081_v32 }
 0x7f4   : > { %v1084_v34 = vpop.f32.mrb[22].mxu0 }
 0x7f5   : > { %v2309_v35 = vpop.f32.mrb[23].mxu0  ;;  %v1088_v38 = vmul.f32 %v1087_v36, %v1081_v32 }
 0x7f7   : > { %v1089_v39 = vmul.f32 0.044715, %v1088_v38 }
 0x7f9   : > { %v1090_v40 = vadd.f32 %v1089_v39, %v1081_v32 }
 0x7fb   : > { %v1091_v41 = vmul.f32 0.7978846, %v1090_v40 }
 0x7fd   : > { %2480 = vtanh.f32 %v1091_v41 }
 0x807   : > { %v2481_v42 = vpop.eup %2480 }
 0x808   : > { %v1093_v43 = vadd.f32 1.0, %v2481_v42 }
 0x80a   : > { %v1094_v45 = vmul.f32 0.5, %v1093_v43 }
 0x80c   : > { %v1095_v46 = vmul.f32 %v1094_v45, %v1081_v32 }
 0x865   : > { %v1098_v47 = vpop.permute.xlu1 %1097 }
 0x866   : > { %v1100_v48 = vmul.f32 %v1098_v47, %v1095_v46 }
 0x868   : > { %v1101_v49 = vpack.c.bf16 %v1100_v48, %v1100_v48 }
 0x86a   : > { %2319 = vmatmul.mubr.msk.bf16.vlgmr.msra.gmra.mrb[20].mxu1 %vm1134_vm6, %v1101_v49 }
 0x86b   : > { %2338 = vmatprep.mubr.msk.bf16.mxu1 %vm2515_vm1, %v2514_v4 }
 0x93d   : > { %v1172_v50 = vpop.f32.mrb[20].mxu1 }
 0x93e   : > { %v2772_v52 = vadd.f32 %v1172_v50, %v1010_v12  ;;  %v2320_v53 = vpop.f32.mrb[21].mxu1 }
 0x93f   : > { %v1175_v54 = vpop.f32.mrb[22].mxu1 }
 0x940   : > { %v2321_v55 = vpop.f32.mrb[23].mxu1  ;;  %v1179_v56 = vmul.f32 %v2772_v52, %v2772_v52 }
 0x942   : > { %v1180_v57 = vsel %vm403_vm0, %v1179_v56, 0.0 }
 0x943   : > { %1181 = vadd.xlane.f32.xlu1 %v1180_v57 }
 0x9d0   : > { %v1182_v60 = vpop.xlane.xlu1 %1181 }
 0x9d1   : > { %v1183_v61 = vmul.f32 0.03125, %v1182_v60 }
 0x9d3   : > { %v1184_v62 = vadd.f32 1e-06, %v1183_v61 }
 0x9d5   : > { %2482 = vrsqrt.f32 %v1184_v62 }
 0x9df   : > { %v2483_v63 = vpop.eup %2482 }
 0x9e0   : > { %v1186_v2 = vmul.f32 %v2483_v63, %v2772_v52 }
 0x9e2   : > { %v1195_v3 = vmul.f32 %v2121_v1, %v1186_v2 }
 0x9e4   : > { %v1196_v5 = vpack.c.bf16 %v1195_v3, %v1195_v3 }
 0x9e6   : > { %2327 = vmatmul.mubr.msk.bf16.vlgmr.msra.gmra.mrb[24].mxu0 %vm403_vm0, %v1196_v5 }
 0x9e7   : > { %2332 = vmatprep.mubr.msk.bf16.mxu0 %vm2515_vm1, %v2514_v4 }
 0xab9   : > { %v1251_v6 = vpop.f32.mrb[24].mxu0 }
 0xaba   : > { %v2792_v7 = vpack.c.bf16 %v1251_v6, %v1251_v6  ;;  %v2328_v8 = vpop.f32.mrb[25].mxu0 }
 0xabb   : > { %v1254_v9 = vpop.f32.mrb[26].mxu0 }
 0xabc   : > { %1372 = vrot.lane.b32.xlu1 %v2792_v7, %s2516_s29  ;;  %1260 = vrot.lane.b32.xlu0 %v2792_v7, %s2517_s30  ;;  %v2329_v10 = vpop.f32.mrb[27].mxu0  ;;  %s2956_s29 = smov 40   ;;  %s2957_s30 = smov 8  }
 0xac0   : > { %1482 = vrot.lane.b32.xlu1 %v2792_v7, %s2520_s14  ;;  %1370 = vrot.lane.b32.xlu0 %v2792_v7, %s2518_s12 }
 0xac4   : > { %1594 = vrot.lane.b32.xlu1 %v2792_v7, %s2522_s16  ;;  %1484 = vrot.lane.b32.xlu0 %v2792_v7, %s2519_s13  ;;  %s2958_s16 = smov 16  }
 0xac8   : > { %1596 = vrot.lane.b32.xlu0 %v2792_v7, %s2521_s15 }
 0xb2e   : > { %v1261_v11 = vpop.permute.xlu0 %1260  ;;  %v1373_v13 = vpop.permute.xlu1 %1372 }
 0xb2f   : > { %v1266_v12 = vsel %vm485_vm2, %v1261_v11, 0  ;;  %v1378_v16 = vsel %vm485_vm2, %v1373_v13, 0 }
 0xb30   : > { %2331 = vmatpush3.bf16.xpose.msra.mxu0 %v1266_v12 }
 0xb31   : > { %2342 = vmatprep.subr.bf16.mxu0 %v2514_v4 }
 0xb32   : > { %v1371_v14 = vpop.permute.xlu0 %1370  ;;  %v1483_v20 = vpop.permute.xlu1 %1482 }
 0xb36   : > { %v1485_v17 = vpop.permute.xlu0 %1484  ;;  %v1595_v21 = vpop.permute.xlu1 %1594 }
 0xb37   : > { %2333 = vmatmul.mubr.msk.bf16.vlgmr.msra.gmra.mrb[28].mxu0 %vm485_vm2, %v2792_v7  ;;  %v1490_v18 = vsel %vm485_vm2, %v1485_v17, 0 }
 0xb38   : > { %2343 = vmatpush3.bf16.xpose.msra.mxu0 %v1378_v16  ;;  %2344 = vmatprep.mubr.msk.bf16.mxu0 %vm2515_vm1, %v2514_v4 }
 0xb39   : > { %2354 = vmatprep.subr.bf16.mxu0 %v2514_v4 }
 0xb3a   : > { %v1597_v19 = vpop.permute.xlu0 %1596 }
 0xb3b   : > { %v1602_v0 = vsel %vm485_vm2, %v1597_v19, 0 }
 0xb3f   : > { %2345 = vmatmul.mubr.msk.bf16.vlgmr.msra.gmra.mrb[32].mxu0 %vm485_vm2, %v1371_v14 }
 0xb40   : > { %2355 = vmatpush3.bf16.xpose.msra.mxu0 %v1490_v18  ;;  %2356 = vmatprep.mubr.msk.bf16.mxu0 %vm2515_vm1, %v2514_v4 }
 0xb41   : > { %2366 = vmatprep.subr.bf16.mxu0 %v2514_v4 }
 0xb47   : > { %2357 = vmatmul.mubr.msk.bf16.vlgmr.msra.gmra.mrb[36].mxu0 %vm485_vm2, %v1483_v20 }
 0xb48   : > { %2367 = vmatpush3.bf16.xpose.msra.mxu0 %v1602_v0  ;;  %2368 = vmatprep.mubr.msk.bf16.mxu0 %vm2515_vm1, %v2514_v4 }
 0xb49   : > { %2378 = vmatprep.subr.bf16.mxu0 %v2514_v4 }
 0xb4f   : > { %2369 = vmatmul.mubr.msk.bf16.vlgmr.msra.gmra.mrb[40].mxu0 %vm485_vm2, %v1595_v21 }
 0xb50   : > { %2382 = vmatprep.mubr.msk.bf16.mxu0 %vm2515_vm1, %v2514_v4 }
 0xc0a   : > { %v1302_v22 = vpop.f32.mrb[28].mxu0 }
 0xc0b   : > { %v1303_v23 = vadd.f32 %v1302_v22, %v2671_v30  ;;  %v2334_v24 = vpop.f32.mrb[29].mxu0 }
 0xc0c   : > { %v1305_v25 = vpop.f32.mrb[30].mxu0 }
 0xc0d   : > { %v2335_v26 = vpop.f32.mrb[31].mxu0  ;;  %v1308_v27 = vsel %vm485_vm2, %v1303_v23, -inf }
 0xc0e   : > { %1309 = vmax.xlane.f32.xlu0 %v1308_v27 }
 0xc12   : > { %v1414_v28 = vpop.f32.mrb[32].mxu0 }
 0xc13   : > { %v1415_v15 = vadd.f32 %v2675_v37, %v1414_v28  ;;  %v2346_v29 = vpop.f32.mrb[33].mxu0 }
 0xc14   : > { %v1417_v31 = vpop.f32.mrb[34].mxu0 }
 0xc15   : > { %v2347_v32 = vpop.f32.mrb[35].mxu0  ;;  %v1420_v33 = vsel %vm485_vm2, %v1415_v15, -inf }
 0xc16   : > { %1421 = vmax.xlane.f32.xlu1 %v1420_v33 }
 0xc1a   : > { %v1526_v34 = vpop.f32.mrb[36].mxu0 }
 0xc1b   : > { %v1527_v35 = vadd.f32 %v2679_v44, %v1526_v34  ;;  %v2358_v36 = vpop.f32.mrb[37].mxu0 }
 0xc1c   : > { %v1529_v30 = vpop.f32.mrb[38].mxu0 }
 0xc1d   : > { %v2359_v38 = vpop.f32.mrb[39].mxu0  ;;  %v1532_v39 = vsel %vm485_vm2, %v1527_v35, -inf }
 0xc1e   : > { %1533 = vmax.xlane.f32.xlu0 %v1532_v39 }
 0xc22   : > { %v1638_v40 = vpop.f32.mrb[40].mxu0 }
 0xc23   : > { %v1639_v41 = vadd.f32 %v2683_v51, %v1638_v40  ;;  %v2370_v42 = vpop.f32.mrb[41].mxu0  ;;  %v2450_v40 = vld [vmem:[%s2944_s4 + $0x10] sm:$0xff]  }
 0xc24   : > { %v1641_v37 = vpop.f32.mrb[42].mxu0  ;;  %2379 = vmatpush3.bf16.msra.mxu0 %v2450_v40 }
 0xc25   : > { %v2371_v43 = vpop.f32.mrb[43].mxu0  ;;  %v1644_v45 = vsel %vm485_vm2, %v1639_v41, -inf  ;;  %2380 = vmatprep.subr.bf16.mxu0 %v2514_v4 }
 0xc26   : > { %1645 = vmax.xlane.f32.xlu0 %v1644_v45 }
 0xc9b   : > { %v1310_v46 = vpop.xlane.xlu0 %1309 }
 0xc9c   : > { %v1311_v47 = vsub.f32 %v1303_v23, %v1310_v46 }
 0xc9e   : > { %v1312_v48 = vmul.f32 1.442695, %v1311_v47 }
 0xca0   : > { %2484 = vpow2.f32 %v1312_v48 }
 0xca3   : > { %v1422_v44 = vpop.xlane.xlu1 %1421 }
 0xca4   : > { %v1423_v49 = vsub.f32 %v1415_v15, %v1422_v44 }
 0xca6   : > { %v1424_v50 = vmul.f32 1.442695, %v1423_v49 }
 0xca8   : > { %2486 = vpow2.f32 %v1424_v50 }
 0xcaa   : > { %v2485_v53 = vpop.eup %2484 }
 0xcab   : > { %v1314_v54 = vsel %vm485_vm2, %v2485_v53, 0.0  ;;  %v1534_v55 = vpop.xlane.xlu0 %1533 }
 0xcac   : > { %1315 = vadd.xlane.f32.xlu1 %v1314_v54  ;;  %v1535_v62 = vsub.f32 %v1527_v35, %v1534_v55 }
 0xcae   : > { %v1536_v63 = vmul.f32 1.442695, %v1535_v62 }
 0xcb2   : > { %v2487_v51 = vpop.eup %2486 }
 0xcb3   : > { %v1646_v56 = vpop.xlane.xlu0 %1645  ;;  %v1426_v57 = vsel %vm485_vm2, %v2487_v51, 0.0 }
 0xcb4   : > { %v1647_v58 = vsub.f32 %v1639_v41, %v1646_v56  ;;  %1427 = vadd.xlane.f32.xlu0 %v1426_v57  ;;  %v2451_v41 = vld [vmem:[%s2944_s4 + $0x18] sm:$0xff]  }
 0xcb5   : > { %2381 = vmatpush3.bf16.msra.mxu0 %v2451_v41 }
 0xcb6   : > { %v1648_v59 = vmul.f32 1.442695, %v1647_v58  ;;  %2394 = vmatprep.subr.bf16.mxu0 %v2514_v4 }
 0xcb8   : > { %2488 = vpow2.f32 %v1648_v59 }
 0xcb9   : > { %2490 = vpow2.f32 %v1536_v63 }
 0xcbd   : > { %1321 = vrot.lane.b32.xlu1 %v2792_v7, %s2524_s24 }
 0xcc2   : > { %v2489_v60 = vpop.eup %2488 }
 0xcc3   : > { %v1650_v61 = vsel %vm485_vm2, %v2489_v60, 0.0  ;;  %v2491_v1 = vpop.eup %2490 }
 0xcc4   : > { %1651 = vadd.xlane.f32.xlu0 %v1650_v61  ;;  %v1538_v2 = vsel %vm485_vm2, %v2491_v1, 0.0 }
 0xcda   : > { %1433 = vrot.lane.b32.xlu0 %v2792_v7, %s2523_s23  ;;  %s2959_s23 = smov 24  }
 0xce1   : > { %1539 = vadd.xlane.f32.xlu1 %v1538_v2  ;;  %v2453_v2 = vld [vmem:[%s2946_s6 + $0x18] sm:$0xff]  }
 0xcf2   : > { %1545 = vrot.lane.b32.xlu1 %v2792_v7, %s2526_s26 }
 0xcf6   : > { %1657 = vrot.lane.b32.xlu1 %v2792_v7, %s2956_s29 }
 0xd39   : > { %v1316_v3 = vpop.xlane.xlu1 %1315 }
 0xd3a   : > { %v1317_v5 = vadd.f32 1e-09, %v1316_v3 }
 0xd3c   : > { %2492 = vrcp.f32 %v1317_v5 }
 0xd3d   : > { %v1322_v6 = vpop.permute.xlu1 %1321 }
 0xd3e   : > { %v1327_v8 = vsel %vm550_vm3, %v1322_v6, 0 }
 0xd3f   : > { %2337 = vmatpush3.bf16.msra.mxu1 %v1327_v8  ;;  %v2148_v8 = vld [vmem:[%s2945_s5 + $0x1] ss:$0 sm:$0xff] }
 0xd40   : > { %2348 = vmatprep.subr.bf16.mxu1 %v2514_v4 }
 0xd41   : > { %v1428_v9 = vpop.xlane.xlu0 %1427 }
 0xd42   : > { %v1429_v10 = vadd.f32 1e-09, %v1428_v9 }
 0xd44   : > { %2494 = vrcp.f32 %v1429_v10 }
 0xd46   : > { %v2493_v11 = vpop.eup %2492 }
 0xd47   : > { %v1319_v12 = vmul.f32 %v2493_v11, %v2485_v53 }
 0xd49   : > { %v1320_v13 = vpack.c.bf16 %v1319_v12, %v1319_v12  ;;  %v2454_v12 = vld [vmem:[%s2947_s7 + $0x20] sm:$0xff]  }
 0xd4b   : > { %2339 = vmatmul.mubr.msk.bf16.vlgmr.msra.gmra.mrb[24].mxu1 %vm485_vm2, %v1320_v13  ;;  %v2455_v13 = vld [vmem:[%s2947_s7 + $0x28] sm:$0xff]  }
 0xd4c   : > { %2350 = vmatprep.mubr.msk.bf16.mxu1 %vm2515_vm1, %v2514_v4 }
 0xd4e   : > { %v2495_v7 = vpop.eup %2494 }
 0xd4f   : > { %v1431_v16 = vmul.f32 %v2495_v7, %v2487_v51  ;;  %v2456_v7 = vld [vmem:[%s2947_s7 + $0x30] sm:$0xff]  }
 0xd51   : > { %v1652_v14 = vpop.xlane.xlu0 %1651  ;;  %v1432_v19 = vpack.c.bf16 %v1431_v16, %v1431_v16 }
 0xd52   : > { %v1653_v21 = vadd.f32 1e-09, %v1652_v14  ;;  %v2457_v14 = vld [vmem:[%s2947_s7 + $0x38] sm:$0xff]  }
 0xd55   : > { %v1434_v17 = vpop.permute.xlu0 %1433 }
 0xd56   : > { %v1439_v18 = vsel %vm550_vm3, %v1434_v17, 0 }
 0xd57   : > { %2349 = vmatpush3.bf16.msra.mxu1 %v1439_v18 }
 0xd58   : > { %2360 = vmatprep.subr.bf16.mxu1 %v2514_v4 }
 0xd5a   : > { %2351 = vmatmul.mubr.msk.bf16.vlgmr.msra.gmra.mrb[28].mxu1 %vm485_vm2, %v1432_v19 }
 0xd5b   : > { %2362 = vmatprep.mubr.msk.bf16.mxu1 %vm2515_vm1, %v2514_v4 }
 0xd6e   : > { %v1540_v20 = vpop.xlane.xlu1 %1539 }
 0xd6f   : > { %v1541_v0 = vadd.f32 1e-09, %v1540_v20 }
 0xd71   : > { %2496 = vrcp.f32 %v1541_v0 }
 0xd72   : > { %v1546_v22 = vpop.permute.xlu1 %1545  ;;  %2498 = vrcp.f32 %v1653_v21 }
 0xd73   : > { %v1551_v23 = vsel %vm550_vm3, %v1546_v22, 0 }
 0xd74   : > { %2361 = vmatpush3.bf16.msra.mxu1 %v1551_v23 }
 0xd75   : > { %2372 = vmatprep.subr.bf16.mxu1 %v2514_v4 }
 0xd76   : > { %v1658_v26 = vpop.permute.xlu1 %1657 }
 0xd77   : > { %v1663_v15 = vsel %vm550_vm3, %v1658_v26, 0 }
 0xd7b   : > { %v2497_v24 = vpop.eup %2496 }
 0xd7c   : > { %v1543_v25 = vmul.f32 %v2497_v24, %v2491_v1  ;;  %v2499_v28 = vpop.eup %2498  ;;  %v2452_v1 = vld [vmem:[%s2946_s6 + $0x10] sm:$0xff]  }
 0xd7d   : > { %v1655_v29 = vmul.f32 %v2499_v28, %v2489_v60 }
 0xd7e   : > { %v1544_v27 = vpack.c.bf16 %v1543_v25, %v1543_v25 }
 0xd7f   : > { %v1656_v31 = vpack.c.bf16 %v1655_v29, %v1655_v29 }
 0xd80   : > { %2363 = vmatmul.mubr.msk.bf16.vlgmr.msra.gmra.mrb[32].mxu1 %vm485_vm2, %v1544_v27 }
 0xd81   : > { %2373 = vmatpush3.bf16.msra.mxu1 %v1663_v15  ;;  %2374 = vmatprep.mubr.msk.bf16.mxu1 %vm2515_vm1, %v2514_v4 }
 0xd82   : > { %2386 = vmatprep.subr.bf16.mxu1 %v2514_v4 }
 0xd88   : > { %2375 = vmatmul.mubr.msk.bf16.vlgmr.msra.gmra.mrb[36].mxu1 %vm485_vm2, %v1656_v31 }
 0xd89   : > { %2390 = vmatprep.mubr.msk.bf16.mxu1 %vm2515_vm1, %v2514_v4  ;;  %2387 = vmatpush3.bf16.msra.mxu1 %v2452_v1 }
 0xd8a   : > { %2388 = vmatprep.subr.bf16.mxu1 %v2514_v4 }
 0xd8d   : > { %2389 = vmatpush3.bf16.msra.mxu1 %v2453_v2 }
 0xd8e   : > { %2406 = vmatprep.subr.bf16.mxu1 %v2514_v4 }
 0xe1e   : > { %v1363_v32 = vpop.f32.mrb[24].mxu1 }
 0xe1f   : > { %v2340_v33 = vpop.f32.mrb[25].mxu1 }
 0xe20   : > { %v1366_v34 = vpop.f32.mrb[26].mxu1 }
 0xe21   : > { %v2341_v35 = vpop.f32.mrb[27].mxu1 }
 0xe2d   : > { %v1475_v36 = vpop.f32.mrb[28].mxu1 }
 0xe2e   : > { %1706 = vrot.lane.b32.xlu0 %v1475_v36, %s2957_s30  ;;  %v2352_v30 = vpop.f32.mrb[29].mxu1 }
 0xe2f   : > { %v1478_v38 = vpop.f32.mrb[30].mxu1 }
 0xe30   : > { %v2353_v39 = vpop.f32.mrb[31].mxu1  ;;  %v2458_v38 = vld [vmem:[%s2949_s9] sm:$0xff]  }
 0xe31   : > { %v2459_v39 = vld [vmem:[%s2949_s9 + $0x8] sm:$0xff]  }
 0xe53   : > { %v1587_v42 = vpop.f32.mrb[32].mxu1 }
 0xe54   : > { %1710 = vrot.lane.b32.xlu1 %v1587_v42, %s2958_s16  ;;  %v2364_v37 = vpop.f32.mrb[33].mxu1 }
 0xe55   : > { %v1590_v43 = vpop.f32.mrb[34].mxu1 }
 0xe56   : > { %v2365_v45 = vpop.f32.mrb[35].mxu1  ;;  %v1961_v43 = vld [vmem:[%s2948_s8] sm:$0x1] }
 0xe5b   : > { %v1699_v46 = vpop.f32.mrb[36].mxu1 }
 0xe5c   : > { %1714 = vrot.lane.b32.xlu0 %v1699_v46, %s2959_s23  ;;  %v2376_v47 = vpop.f32.mrb[37].mxu1 }
 0xe5d   : > { %v1702_v48 = vpop.f32.mrb[38].mxu1 }
 0xe5e   : > { %v2377_v44 = vpop.f32.mrb[39].mxu1  ;;  %v1968_v48 = vld [vmem:[%s2950_s10] sm:$0x1] }
 0xea0   : > { %v1707_v49 = vpop.permute.xlu0 %1706 }
 0xea1   : > { %v1717_v53 = vsel %vm485_vm2, %v1363_v32, %v1707_v49 }
 0xec6   : > { %v1711_v50 = vpop.permute.xlu1 %1710 }
 0xec7   : > { %v1718_v54 = vsel %vm946_vm4, %v1717_v53, %v1711_v50 }
 0xece   : > { %v1715_v55 = vpop.permute.xlu0 %1714 }
 0xecf   : > { %v1719_v51 = vsel %vm948_vm5, %v1718_v54, %v1715_v55 }
 0xed0   : > { %v1720_v56 = vpack.c.bf16 %v1719_v51, %v1719_v51 }
 0xed2   : > { %2383 = vmatmul.mubr.msk.bf16.vlgmr.msra.gmra.mrb[44].mxu0 %vm403_vm0, %v1720_v56 }
 0xed3   : > { %2402 = vmatprep.mubr.msk.bf16.mxu0 %vm2515_vm1, %v2514_v4  ;;  %2395 = vmatpush3.bf16.msra.mxu0 %v2454_v12 }
 0xed4   : > { %2396 = vmatprep.subr.bf16.mxu0 %v2514_v4 }
 0xed7   : > { %2397 = vmatpush3.bf16.msra.mxu0 %v2455_v13 }
 0xed8   : > { %2398 = vmatprep.subr.bf16.mxu0 %v2514_v4 }
 0xedb   : > { %2399 = vmatpush3.bf16.msra.mxu0 %v2456_v7 }
 0xedc   : > { %2400 = vmatprep.subr.bf16.mxu0 %v2514_v4 }
 0xedf   : > { %2401 = vmatpush3.bf16.msra.mxu0 %v2457_v14 }
 0xfa5   : > { %v1775_v57 = vpop.f32.mrb[44].mxu0 }
 0xfa6   : > { %v1781_v58 = vadd.f32 %v1775_v57, %v2772_v52  ;;  %v2384_v59 = vpop.f32.mrb[45].mxu0 }
 0xfa7   : > { %v1778_v60 = vpop.f32.mrb[46].mxu0 }
 0xfa8   : > { %v2385_v61 = vpop.f32.mrb[47].mxu0  ;;  %v1782_v62 = vmul.f32 %v1781_v58, %v1781_v58 }
 0xfaa   : > { %v1783_v63 = vsel %vm403_vm0, %v1782_v62, 0.0 }
 0xfab   : > { %1784 = vadd.xlane.f32.xlu1 %v1783_v63 }
0x1038   : > { %v1785_v52 = vpop.xlane.xlu1 %1784 }
0x1039   : > { %v1786_v3 = vmul.f32 0.03125, %v1785_v52 }
0x103b   : > { %v1787_v5 = vadd.f32 1e-06, %v1786_v3 }
0x103d   : > { %2500 = vrsqrt.f32 %v1787_v5 }
0x1047   : > { %v2501_v6 = vpop.eup %2500 }
0x1048   : > { %v1789_v9 = vmul.f32 %v2501_v6, %v1781_v58 }
0x104a   : > { %v1798_v10 = vmul.f32 %v2148_v8, %v1789_v9 }
0x104c   : > { %v1799_v11 = vpack.c.bf16 %v1798_v10, %v1798_v10 }
0x104e   : > { %2391 = vmatmul.mubr.msk.bf16.vlgmr.msra.gmra.mrb[40].mxu1 %vm403_vm0, %v1799_v11 }
0x104f   : > { %2410 = vmatprep.mubr.msk.bf16.mxu1 %vm2515_vm1, %v2514_v4  ;;  %2407 = vmatpush3.bf16.msra.mxu1 %v2458_v38 }
0x1050   : > { %2408 = vmatprep.subr.bf16.mxu1 %v2514_v4 }
0x1053   : > { %2409 = vmatpush3.bf16.msra.mxu1 %v2459_v39 }
0x1121   : > { %v1854_v16 = vpop.f32.mrb[40].mxu1 }
0x1122   : > { %1870 = vrot.lane.b32.xlu0 %v1854_v16, %s2524_s24  ;;  %v2392_v17 = vpop.f32.mrb[41].mxu1  ;;  %v1860_v20 = vmul.f32 %v1854_v16, %v1854_v16 }
0x1123   : > { %v1857_v18 = vpop.f32.mrb[42].mxu1 }
0x1124   : > { %v2393_v19 = vpop.f32.mrb[43].mxu1  ;;  %v1861_v0 = vmul.f32 %v1860_v20, %v1854_v16 }
0x1126   : > { %v1862_v21 = vmul.f32 0.044715, %v1861_v0 }
0x1128   : > { %v1863_v22 = vadd.f32 %v1862_v21, %v1854_v16 }
0x112a   : > { %v1864_v23 = vmul.f32 0.7978846, %v1863_v22 }
0x112c   : > { %2502 = vtanh.f32 %v1864_v23 }
0x1136   : > { %v2503_v24 = vpop.eup %2502 }
0x1137   : > { %v1866_v25 = vadd.f32 1.0, %v2503_v24 }
0x1139   : > { %v1867_v26 = vmul.f32 0.5, %v1866_v25 }
0x113b   : > { %v1868_v27 = vmul.f32 %v1867_v26, %v1854_v16 }
0x1194   : > { %v1871_v28 = vpop.permute.xlu0 %1870 }
0x1195   : > { %v1873_v15 = vmul.f32 %v1871_v28, %v1868_v27 }
0x1197   : > { %v1874_v29 = vpack.c.bf16 %v1873_v15, %v1873_v15 }
0x1199   : > { %2403 = vmatmul.mubr.msk.bf16.vlgmr.msra.gmra.mrb[48].mxu0 %vm1134_vm6, %v1874_v29 }
0x126c   : > { %v1945_v31 = vpop.f32.mrb[48].mxu0 }
0x126d   : > { %v1951_v32 = vadd.f32 %v1945_v31, %v1781_v58  ;;  %v2404_v33 = vpop.f32.mrb[49].mxu0 }
0x126e   : > { %v1948_v34 = vpop.f32.mrb[50].mxu0 }
0x126f   : > { %v2405_v35 = vpop.f32.mrb[51].mxu0  ;;  %v1952_v36 = vmul.f32 %v1951_v32, %v1951_v32 }
0x1271   : > { %v1954_v30 = vsel %vm1953_vm7, %v1952_v36, 0.0 }
0x1272   : > { %1955 = vadd.xlane.f32.xlu0 %v1954_v30 }
0x12ff   : > { %v1956_v40 = vpop.xlane.xlu0 %1955 }
0x1300   : > { %v1957_v41 = vmul.f32 0.03125, %v1956_v40 }
0x1302   : > { %v1958_v42 = vadd.f32 1e-06, %v1957_v41 }
0x1304   : > { %2504 = vrsqrt.f32 %v1958_v42 }
0x130e   : > { %v2505_v37 = vpop.eup %2504 }
0x130f   : > { %v1960_v45 = vmul.f32 %v2505_v37, %v1951_v32 }
0x1311   : > { %v1962_v46 = vmul.f32 %v1961_v43, %v1960_v45 }
0x1313   : > { %v1963_v47 = vpack.c.bf16 %v1962_v46, %v1962_v46 }
0x1315   : > { %2411 = vmatmul.mubr.msk.bf16.vlgmr.msra.gmra.mrb[44].mxu1 %vm403_vm0, %v1963_v47 }
0x13e8   : > { %v2018_v4 = vpop.f32.mrb[44].mxu1 }
0x13e9   : > { %v2019_v44 = vadd.f32 %v2018_v4, %v1968_v48  ;;  %v2412_v49 = vpop.f32.mrb[45].mxu1 }
0x13ea   : > { %v2021_v50 = vpop.f32.mrb[46].mxu1 }
0x13eb   : > { %2025 = vst.msk [vmem:[%s399_s22] sm:$0x1] %vm2024_vm8, %v2019_v44  ;;  %v2413_v53 = vpop.f32.mrb[47].mxu1 }
0x13ec PF: > { %s21_s17 = sadd.s32 1, %s2512_s17  }
0x13ed   : > { %p18_p4 = scmp.ge.s32.totalorder %s21_s17, 4  }
0x13ef   :  { %20 = sbr.rel (!%p18_p4) target bundleno = 1 (0x1), region = 106 }

</bundles_post_ra>
